<compile_context>
chip_gen: v7x
topology: tpu7x:2x2x1
jax: 0.10.0
libtpu: 0.0.40
codegen_flags: <defaults>
</compile_context>

<pallas_src>
import jax
import jax.numpy as jnp
from jax import lax
from jax.experimental import pallas as pl
from jax.experimental.pallas import tpu as pltpu  # noqa: F401  (TPU lowering)


def _decoder_seq_kernel(embeds_ref, h0_ref, ctx0_ref, enc_ref,
                        wx_ref, wc_ref, wh_ref, bx_ref, bhn_ref,
                        watt_ref, wfch_ref, wfcc_ref, bfc_ref,
                        lp_ref, ctx_out_ref, hid_out_ref, attn_out_ref):
    """Runs T attention-decoder steps entirely in VMEM; writes outputs once."""
    T, H = embeds_ref.shape
    f32 = jnp.float32
    dotf = lambda a, b: jnp.dot(a, b, preferred_element_type=f32)

    enc = enc_ref[...]                      # (S, H) encoder outputs (resident)
    embeds = embeds_ref[...]                # (T, H) word embeddings (resident)

    # ---- non-recurrent GRU input path, batched over all T steps ----
    # gx_g = embeds @ Wx_g + (b_ih_g [+ b_hh_g for r,z]); off the critical chain.
    gx_r = dotf(embeds, wx_ref[0]) + bx_ref[0]      # (T, H)
    gx_z = dotf(embeds, wx_ref[1]) + bx_ref[1]
    gx_n = dotf(embeds, wx_ref[2]) + bx_ref[2]

    wc_r, wc_z, wc_n = wc_ref[0], wc_ref[1], wc_ref[2]   # ctx path (H, H) each
    wh_r, wh_z, wh_n = wh_ref[0], wh_ref[1], wh_ref[2]   # hidden path (H, H)
    bhn = bhn_ref[...]                                   # (1, H)
    watt = watt_ref[...]                                 # (H, H)

    h = h0_ref[...]                          # (1, H) previous hidden
    ctx = ctx0_ref[...]                      # (1, H) previous attention context
    h_rows, c_rows, a_rows = [], [], []

    # Static Python loop: T is small & static -> fully static indexing, full
    # scheduler visibility, zero per-step dispatch/DMA overhead.
    for t in range(T):
        # ---- GRU cell (PyTorch gate order r, z, n), all operands lane-aligned
        r = jax.nn.sigmoid(gx_r[t:t + 1, :] + dotf(ctx, wc_r) + dotf(h, wh_r))
        z = jax.nn.sigmoid(gx_z[t:t + 1, :] + dotf(ctx, wc_z) + dotf(h, wh_z))
        n = jnp.tanh(gx_n[t:t + 1, :] + dotf(ctx, wc_n)
                     + r * (dotf(h, wh_n) + bhn))
        h = (1.0 - z) * n + z * h                          # (1, H)

        # ---- 'general' attention: scores_i = (h @ W_att) . enc_i
        #      (att bias dropped: softmax is shift-invariant)
        q = dotf(h, watt)                                  # (1, H)
        scores = lax.dot_general(q, enc,
                                 dimension_numbers=(((1,), (1,)), ((), ())),
                                 preferred_element_type=f32)      # (1, S)
        e = jnp.exp(scores - jnp.max(scores, axis=-1, keepdims=True))
        # Exact reciprocal: approx error would compound through the ctx carry.
        attn = e * pl.reciprocal(jnp.sum(e, axis=-1, keepdims=True),
                                 approx=False)
        ctx = dotf(attn, enc)                              # (1, H)

        h_rows.append(h)
        c_rows.append(ctx)
        a_rows.append(attn)

    hbuf = jnp.concatenate(h_rows, axis=0)                 # (T, H)
    cbuf = jnp.concatenate(c_rows, axis=0)                 # (T, H)
    abuf = jnp.concatenate(a_rows, axis=0)                 # (T, S)

    # ---- non-recurrent tail, hoisted out of the loop and batched over T ----
    logits = dotf(hbuf, wfch_ref[...]) + dotf(cbuf, wfcc_ref[...]) + bfc_ref[...]
    ls = logits - jnp.max(logits, axis=-1, keepdims=True)
    log_probs = ls - jnp.log(jnp.sum(jnp.exp(ls), axis=-1, keepdims=True))

    # ---- single writeback per output ----
    lp_ref[...] = log_probs
    ctx_out_ref[...] = cbuf
    hid_out_ref[...] = hbuf
    attn_out_ref[...] = abuf


def prepare_params(params):
    """One-time weight packing; keep this OUT of the per-token hot path.

    Splits the GRU / fc1 weights per source (embed / context / hidden) and per
    gate so the kernel never concatenates along lanes nor slices gates at
    misaligned lane offsets; folds the r/z biases into the precomputable
    embed path."""
    H = params["hidden_size"]
    O = params["output_size"]
    w_ih = params["gru_w_ih"].astype(jnp.float32)    # (3H, 2H)  input = [embed|ctx]
    w_hh = params["gru_w_hh"].astype(jnp.float32)    # (3H, H)
    b_ih = params["gru_b_ih"].astype(jnp.float32)    # (3H,)
    b_hh = params["gru_b_hh"].astype(jnp.float32)    # (3H,)
    gate = lambda w, g: w[g * H:(g + 1) * H]

    wx = jnp.stack([gate(w_ih, g)[:, :H].T for g in range(3)])   # (3,H,H) embed path
    wc = jnp.stack([gate(w_ih, g)[:, H:].T for g in range(3)])   # (3,H,H) ctx path
    wh = jnp.stack([gate(w_hh, g).T for g in range(3)])          # (3,H,H) hidden path
    bx = jnp.stack([(b_ih[0:H] + b_hh[0:H]).reshape(1, H),       # r: b_ih + b_hh folded
                    (b_ih[H:2 * H] + b_hh[H:2 * H]).reshape(1, H),
                    b_ih[2 * H:3 * H].reshape(1, H)])            # n: b_ih only
    bhn = b_hh[2 * H:3 * H].reshape(1, H)                        # n: b_hh stays inside r*(.)

    fc_w = params["fc1_w"].astype(jnp.float32)                   # (O, 2H)
    return {
        "embedding": params["embedding"].astype(jnp.float32),    # (O, H)
        "wx": wx, "wc": wc, "wh": wh, "bx": bx, "bhn": bhn,
        "att_w": params["att_w"].astype(jnp.float32),            # (H, H); q = h @ att_w
        "wfc_h": fc_w[:, :H].T.astype(jnp.float32),              # (H, O)
        "wfc_c": fc_w[:, H:].T.astype(jnp.float32),              # (H, O)
        "b_fc": params["fc1_b"].reshape(1, O).astype(jnp.float32),
    }


def decode_steps(tokens, decoder_init_hidden, encoder_outputs, init_context,
                 packed):
    """Run T teacher-forced attention-decoder steps in ONE un-gridded
    pallas_call with everything resident in VMEM."""
    H = packed["att_w"].shape[0]
    O = packed["b_fc"].shape[-1]
    T = tokens.shape[0]
    S = encoder_outputs.shape[0]

    # Glue (cheap, hoisted): embedding gather for all steps at once.
    embeds = packed["embedding"][tokens].reshape(T, H).astype(jnp.float32)
    h0 = decoder_init_hidden.reshape(1, H).astype(jnp.float32)
    ctx0 = init_context.reshape(1, H).astype(jnp.float32)
    enc2d = encoder_outputs.reshape(S, H).astype(jnp.float32)

    out_shapes = (jax.ShapeDtypeStruct((T, O), jnp.float32),   # log-probs
                  jax.ShapeDtypeStruct((T, H), jnp.float32),   # contexts
                  jax.ShapeDtypeStruct((T, H), jnp.float32),   # hiddens
                  jax.ShapeDtypeStruct((T, S), jnp.float32))   # attention weights

    lp, ctxs, hids, attns = pl.pallas_call(
        _decoder_seq_kernel,
        out_shape=out_shapes,
    )(embeds, h0, ctx0, enc2d,
      packed["wx"], packed["wc"], packed["wh"], packed["bx"], packed["bhn"],
      packed["att_w"], packed["wfc_h"], packed["wfc_c"], packed["b_fc"])
    return lp, ctxs, hids, attns


def attened_decoder_forward(word_input, decoder_last_hidden, encoder_outputs,
                            last_context, packed):
    """Single-step forward with the original module's signature / shapes."""
    H = packed["att_w"].shape[0]
    S = encoder_outputs.shape[0]
    tokens = jnp.asarray(word_input, jnp.int32).reshape(1)
    lp, ctx, hid, attn = decode_steps(tokens, decoder_last_hidden,
                                      encoder_outputs, last_context, packed)
    out = lp                                   # (1, O) log-softmax of fc1
    context = ctx                              # (1, H)
    rnn_hidden = hid.reshape(1, 1, H)          # (n_layers, B, H)
    atten_scores = attn.reshape(1, 1, S)       # (1, 1, seq_len)
    return out, context, rnn_hidden, atten_scores


# ---------------------------------------------------------------------------
# Pure-JAX reference (mirrors the PyTorch forward exactly, incl. att bias).
# ---------------------------------------------------------------------------
def _reference_decode(tokens, decoder_init_hidden, encoder_outputs,
                      init_context, params):
    H = params["hidden_size"]
    S = encoder_outputs.shape[0]
    enc = encoder_outputs.reshape(S, H)
    h = decoder_init_hidden.reshape(1, H)
    ctx = init_context.reshape(1, H)
    outs, ctxs, hids, attns = [], [], [], []
    for t in range(tokens.shape[0]):
        we = params["embedding"][tokens[t]].reshape(1, H)
        x = jnp.concatenate([we, ctx], axis=1)
        gi = x @ params["gru_w_ih"].T + params["gru_b_ih"]
        gh = h @ params["gru_w_hh"].T + params["gru_b_hh"]
        r = jax.nn.sigmoid(gi[:, 0:H] + gh[:, 0:H])
        z = jax.nn.sigmoid(gi[:, H:2 * H] + gh[:, H:2 * H])
        n = jnp.tanh(gi[:, 2 * H:3 * H] + r * gh[:, 2 * H:3 * H])
        h = (1.0 - z) * n + z * h
        attened = enc @ params["att_w"].T + params["att_b"]
        scores = (attened * h).sum(-1)
        attn = jax.nn.softmax(scores).reshape(1, S)
        ctx = attn @ enc
        logits = jnp.concatenate([h, ctx], axis=1) @ params["fc1_w"].T \
            + params["fc1_b"]
        outs.append(jax.nn.log_softmax(logits, axis=-1))
        ctxs.append(ctx)
        hids.append(h)
        attns.append(attn)
    return (jnp.concatenate(outs, 0), jnp.concatenate(ctxs, 0),
            jnp.concatenate(hids, 0), jnp.concatenate(attns, 0))


if __name__ == "__main__":
    H, O, S, T = 32, 50, 8, 6     # hidden, vocab, encoder seq_len, decode steps
    key = jax.random.PRNGKey(0)
    ks = jax.random.split(key, 12)

    params = {
        "hidden_size": H,
        "output_size": O,
        "embedding": jax.random.normal(ks[0], (O, H), jnp.float32),
        "gru_w_ih": 0.2 * jax.random.normal(ks[1], (3 * H, 2 * H), jnp.float32),
        "gru_w_hh": 0.2 * jax.random.normal(ks[2], (3 * H, H), jnp.float32),
        "gru_b_ih": 0.1 * jax.random.normal(ks[3], (3 * H,), jnp.float32),
        "gru_b_hh": 0.1 * jax.random.normal(ks[4], (3 * H,), jnp.float32),
        "att_w": 0.2 * jax.random.normal(ks[5], (H, H), jnp.float32),
        "att_b": 0.1 * jax.random.normal(ks[6], (H,), jnp.float32),
        "fc1_w": 0.2 * jax.random.normal(ks[7], (O, 2 * H), jnp.float32),
        "fc1_b": 0.1 * jax.random.normal(ks[8], (O,), jnp.float32),
    }
    packed = prepare_params(params)   # one-time, outside the per-token path

    decoder_last_hidden = jax.random.normal(ks[9], (1, 1, H), jnp.float32)
    encoder_outputs = jax.random.normal(ks[10], (S, 1, H), jnp.float32)
    last_context = jax.random.normal(ks[11], (1, H), jnp.float32)
    tokens = jnp.array([3, 7, 1, 0, 42, 5], dtype=jnp.int32)
    assert tokens.shape[0] == T

    # ---- multi-step fused decode (T steps, ONE kernel invocation) ----
    decode_jit = jax.jit(decode_steps)
    lp, ctxs, hids, attns = jax.block_until_ready(
        decode_jit(tokens, decoder_last_hidden, encoder_outputs,
                   last_context, packed))
    r_lp, r_ctx, r_hid, r_attn = _reference_decode(
        tokens, decoder_last_hidden, encoder_outputs, last_context, params)

    # step-0 hidden only goes through matmuls + sigmoid/tanh -> tight check
    assert jnp.allclose(hids[0], r_hid[0], atol=1e-4, rtol=1e-4), \
        jnp.abs(hids[0] - r_hid[0]).max()
    # exact softmax reciprocal -> ~10x tighter than the previous 2e-2 tolerance
    for got, ref in ((lp, r_lp), (ctxs, r_ctx), (hids, r_hid), (attns, r_attn)):
        assert got.shape == ref.shape, (got.shape, ref.shape)
        assert jnp.allclose(got, ref, atol=2e-3, rtol=2e-3), \
            jnp.abs(got - ref).max()

    # ---- single-step forward with the original module's signature ----
    forward_jit = jax.jit(attened_decoder_forward)
    outs = jax.block_until_ready(
        forward_jit(jnp.int32(3), decoder_last_hidden, encoder_outputs,
                    last_context, packed))
    s_lp, s_ctx, s_hid, s_attn = _reference_decode(
        jnp.array([3], jnp.int32), decoder_last_hidden, encoder_outputs,
        last_context, params)
    refs = (s_lp, s_ctx, s_hid.reshape(1, 1, H), s_attn.reshape(1, 1, S))
    for got, ref in zip(outs, refs):
        assert got.shape == ref.shape, (got.shape, ref.shape)
        assert jnp.allclose(got, ref, atol=2e-3, rtol=2e-3), \
            jnp.abs(got - ref).max()

    print("KERNEL_OK")
</pallas_src>

<mosaic_0001>
module attributes {stable_mosaic.version = 11 : i64} {
  func.func @_decoder_seq_kernel(%arg0: memref<6x32xf32, #tpu.memory_space<vmem>>, %arg1: memref<1x32xf32, #tpu.memory_space<vmem>>, %arg2: memref<1x32xf32, #tpu.memory_space<vmem>>, %arg3: memref<8x32xf32, #tpu.memory_space<vmem>>, %arg4: memref<3x32x32xf32, #tpu.memory_space<vmem>>, %arg5: memref<3x32x32xf32, #tpu.memory_space<vmem>>, %arg6: memref<3x32x32xf32, #tpu.memory_space<vmem>>, %arg7: memref<3x1x32xf32, #tpu.memory_space<vmem>>, %arg8: memref<1x32xf32, #tpu.memory_space<vmem>>, %arg9: memref<32x32xf32, #tpu.memory_space<vmem>>, %arg10: memref<32x50xf32, #tpu.memory_space<vmem>>, %arg11: memref<32x50xf32, #tpu.memory_space<vmem>>, %arg12: memref<1x50xf32, #tpu.memory_space<vmem>>, %arg13: memref<6x50xf32, #tpu.memory_space<vmem>>, %arg14: memref<6x32xf32, #tpu.memory_space<vmem>>, %arg15: memref<6x32xf32, #tpu.memory_space<vmem>>, %arg16: memref<6x8xf32, #tpu.memory_space<vmem>>) attributes {dimension_semantics = [], scalar_prefetch = 0 : i64, scratch_operands = 0 : i64, tpu.core_type = #tpu.core_type<tc>} {
    %c0 = arith.constant 0 : index
    %c0_0 = arith.constant 0 : index
    %0 = vector.load %arg3[%c0, %c0_0] : memref<8x32xf32, #tpu.memory_space<vmem>>, vector<8x32xf32>
    %c0_1 = arith.constant 0 : index
    %c0_2 = arith.constant 0 : index
    %1 = vector.load %arg0[%c0_1, %c0_2] : memref<6x32xf32, #tpu.memory_space<vmem>>, vector<6x32xf32>
    %c0_3 = arith.constant 0 : index
    %c0_4 = arith.constant 0 : index
    %c0_5 = arith.constant 0 : index
    %2 = vector.load %arg4[%c0_3, %c0_4, %c0_5] : memref<3x32x32xf32, #tpu.memory_space<vmem>>, vector<1x32x32xf32>
    %3 = vector.shape_cast %2 : vector<1x32x32xf32> to vector<32x32xf32>
    %cst = arith.constant dense<0.000000e+00> : vector<6x32xf32>
    %4 = tpu.matmul %1, %3, %cst {dimension_numbers = #tpu.dot_dimension_numbers<[1], [0], [0], [1], [0, 0, 1, 1], [], []>} : vector<6x32xf32>, vector<32x32xf32>, vector<6x32xf32> -> vector<6x32xf32>
    %c0_6 = arith.constant 0 : index
    %c0_7 = arith.constant 0 : index
    %c0_8 = arith.constant 0 : index
    %5 = vector.load %arg7[%c0_6, %c0_7, %c0_8] : memref<3x1x32xf32, #tpu.memory_space<vmem>>, vector<1x1x32xf32>
    %6 = vector.shape_cast %5 : vector<1x1x32xf32> to vector<1x32xf32>
    %7 = vector.broadcast %6 : vector<1x32xf32> to vector<6x32xf32>
    %8 = arith.addf %4, %7 : vector<6x32xf32>
    %c1 = arith.constant 1 : index
    %c0_9 = arith.constant 0 : index
    %c0_10 = arith.constant 0 : index
    %9 = vector.load %arg4[%c1, %c0_9, %c0_10] : memref<3x32x32xf32, #tpu.memory_space<vmem>>, vector<1x32x32xf32>
    %10 = vector.shape_cast %9 : vector<1x32x32xf32> to vector<32x32xf32>
    %cst_11 = arith.constant dense<0.000000e+00> : vector<6x32xf32>
    %11 = tpu.matmul %1, %10, %cst_11 {dimension_numbers = #tpu.dot_dimension_numbers<[1], [0], [0], [1], [0, 0, 1, 1], [], []>} : vector<6x32xf32>, vector<32x32xf32>, vector<6x32xf32> -> vector<6x32xf32>
    %c1_12 = arith.constant 1 : index
    %c0_13 = arith.constant 0 : index
    %c0_14 = arith.constant 0 : index
    %12 = vector.load %arg7[%c1_12, %c0_13, %c0_14] : memref<3x1x32xf32, #tpu.memory_space<vmem>>, vector<1x1x32xf32>
    %13 = vector.shape_cast %12 : vector<1x1x32xf32> to vector<1x32xf32>
    %14 = vector.broadcast %13 : vector<1x32xf32> to vector<6x32xf32>
    %15 = arith.addf %11, %14 : vector<6x32xf32>
    %c2 = arith.constant 2 : index
    %c0_15 = arith.constant 0 : index
    %c0_16 = arith.constant 0 : index
    %16 = vector.load %arg4[%c2, %c0_15, %c0_16] : memref<3x32x32xf32, #tpu.memory_space<vmem>>, vector<1x32x32xf32>
    %17 = vector.shape_cast %16 : vector<1x32x32xf32> to vector<32x32xf32>
    %cst_17 = arith.constant dense<0.000000e+00> : vector<6x32xf32>
    %18 = tpu.matmul %1, %17, %cst_17 {dimension_numbers = #tpu.dot_dimension_numbers<[1], [0], [0], [1], [0, 0, 1, 1], [], []>} : vector<6x32xf32>, vector<32x32xf32>, vector<6x32xf32> -> vector<6x32xf32>
    %c2_18 = arith.constant 2 : index
    %c0_19 = arith.constant 0 : index
    %c0_20 = arith.constant 0 : index
    %19 = vector.load %arg7[%c2_18, %c0_19, %c0_20] : memref<3x1x32xf32, #tpu.memory_space<vmem>>, vector<1x1x32xf32>
    %20 = vector.shape_cast %19 : vector<1x1x32xf32> to vector<1x32xf32>
    %21 = vector.broadcast %20 : vector<1x32xf32> to vector<6x32xf32>
    %22 = arith.addf %18, %21 : vector<6x32xf32>
    %c0_21 = arith.constant 0 : index
    %c0_22 = arith.constant 0 : index
    %c0_23 = arith.constant 0 : index
    %23 = vector.load %arg5[%c0_21, %c0_22, %c0_23] : memref<3x32x32xf32, #tpu.memory_space<vmem>>, vector<1x32x32xf32>
    %24 = vector.shape_cast %23 : vector<1x32x32xf32> to vector<32x32xf32>
    %c1_24 = arith.constant 1 : index
    %c0_25 = arith.constant 0 : index
    %c0_26 = arith.constant 0 : index
    %25 = vector.load %arg5[%c1_24, %c0_25, %c0_26] : memref<3x32x32xf32, #tpu.memory_space<vmem>>, vector<1x32x32xf32>
    %26 = vector.shape_cast %25 : vector<1x32x32xf32> to vector<32x32xf32>
    %c2_27 = arith.constant 2 : index
    %c0_28 = arith.constant 0 : index
    %c0_29 = arith.constant 0 : index
    %27 = vector.load %arg5[%c2_27, %c0_28, %c0_29] : memref<3x32x32xf32, #tpu.memory_space<vmem>>, vector<1x32x32xf32>
    %28 = vector.shape_cast %27 : vector<1x32x32xf32> to vector<32x32xf32>
    %c0_30 = arith.constant 0 : index
    %c0_31 = arith.constant 0 : index
    %c0_32 = arith.constant 0 : index
    %29 = vector.load %arg6[%c0_30, %c0_31, %c0_32] : memref<3x32x32xf32, #tpu.memory_space<vmem>>, vector<1x32x32xf32>
    %30 = vector.shape_cast %29 : vector<1x32x32xf32> to vector<32x32xf32>
    %c1_33 = arith.constant 1 : index
    %c0_34 = arith.constant 0 : index
    %c0_35 = arith.constant 0 : index
    %31 = vector.load %arg6[%c1_33, %c0_34, %c0_35] : memref<3x32x32xf32, #tpu.memory_space<vmem>>, vector<1x32x32xf32>
    %32 = vector.shape_cast %31 : vector<1x32x32xf32> to vector<32x32xf32>
    %c2_36 = arith.constant 2 : index
    %c0_37 = arith.constant 0 : index
    %c0_38 = arith.constant 0 : index
    %33 = vector.load %arg6[%c2_36, %c0_37, %c0_38] : memref<3x32x32xf32, #tpu.memory_space<vmem>>, vector<1x32x32xf32>
    %34 = vector.shape_cast %33 : vector<1x32x32xf32> to vector<32x32xf32>
    %c0_39 = arith.constant 0 : index
    %c0_40 = arith.constant 0 : index
    %35 = vector.load %arg8[%c0_39, %c0_40] : memref<1x32xf32, #tpu.memory_space<vmem>>, vector<1x32xf32>
    %c0_41 = arith.constant 0 : index
    %c0_42 = arith.constant 0 : index
    %36 = vector.load %arg9[%c0_41, %c0_42] : memref<32x32xf32, #tpu.memory_space<vmem>>, vector<32x32xf32>
    %c0_43 = arith.constant 0 : index
    %c0_44 = arith.constant 0 : index
    %37 = vector.load %arg1[%c0_43, %c0_44] : memref<1x32xf32, #tpu.memory_space<vmem>>, vector<1x32xf32>
    %c0_45 = arith.constant 0 : index
    %c0_46 = arith.constant 0 : index
    %38 = vector.load %arg2[%c0_45, %c0_46] : memref<1x32xf32, #tpu.memory_space<vmem>>, vector<1x32xf32>
    %39 = vector.extract_strided_slice %8 {offsets = [0, 0], sizes = [1, 32], strides = [1, 1]} : vector<6x32xf32> to vector<1x32xf32>
    %cst_47 = arith.constant dense<0.000000e+00> : vector<1x32xf32>
    %40 = tpu.matmul %38, %24, %cst_47 {dimension_numbers = #tpu.dot_dimension_numbers<[1], [0], [0], [1], [0, 0, 1, 1], [], []>} : vector<1x32xf32>, vector<32x32xf32>, vector<1x32xf32> -> vector<1x32xf32>
    %41 = arith.addf %39, %40 : vector<1x32xf32>
    %cst_48 = arith.constant dense<0.000000e+00> : vector<1x32xf32>
    %42 = tpu.matmul %37, %30, %cst_48 {dimension_numbers = #tpu.dot_dimension_numbers<[1], [0], [0], [1], [0, 0, 1, 1], [], []>} : vector<1x32xf32>, vector<32x32xf32>, vector<1x32xf32> -> vector<1x32xf32>
    %43 = arith.addf %41, %42 : vector<1x32xf32>
    %44 = arith.negf %43 : vector<1x32xf32>
    %45 = math.exp %44 : vector<1x32xf32>
    %cst_49 = arith.constant 1.000000e+00 : f32
    %46 = vector.broadcast %cst_49 : f32 to vector<1x32xf32>
    %47 = arith.addf %46, %45 : vector<1x32xf32>
    %48 = arith.divf %46, %47 : vector<1x32xf32>
    %49 = vector.extract_strided_slice %15 {offsets = [0, 0], sizes = [1, 32], strides = [1, 1]} : vector<6x32xf32> to vector<1x32xf32>
    %cst_50 = arith.constant dense<0.000000e+00> : vector<1x32xf32>
    %50 = tpu.matmul %38, %26, %cst_50 {dimension_numbers = #tpu.dot_dimension_numbers<[1], [0], [0], [1], [0, 0, 1, 1], [], []>} : vector<1x32xf32>, vector<32x32xf32>, vector<1x32xf32> -> vector<1x32xf32>
    %51 = arith.addf %49, %50 : vector<1x32xf32>
    %cst_51 = arith.constant dense<0.000000e+00> : vector<1x32xf32>
    %52 = tpu.matmul %37, %32, %cst_51 {dimension_numbers = #tpu.dot_dimension_numbers<[1], [0], [0], [1], [0, 0, 1, 1], [], []>} : vector<1x32xf32>, vector<32x32xf32>, vector<1x32xf32> -> vector<1x32xf32>
    %53 = arith.addf %51, %52 : vector<1x32xf32>
    %54 = arith.negf %53 : vector<1x32xf32>
    %55 = math.exp %54 : vector<1x32xf32>
    %cst_52 = arith.constant 1.000000e+00 : f32
    %56 = vector.broadcast %cst_52 : f32 to vector<1x32xf32>
    %57 = arith.addf %56, %55 : vector<1x32xf32>
    %58 = arith.divf %56, %57 : vector<1x32xf32>
    %59 = vector.extract_strided_slice %22 {offsets = [0, 0], sizes = [1, 32], strides = [1, 1]} : vector<6x32xf32> to vector<1x32xf32>
    %cst_53 = arith.constant dense<0.000000e+00> : vector<1x32xf32>
    %60 = tpu.matmul %38, %28, %cst_53 {dimension_numbers = #tpu.dot_dimension_numbers<[1], [0], [0], [1], [0, 0, 1, 1], [], []>} : vector<1x32xf32>, vector<32x32xf32>, vector<1x32xf32> -> vector<1x32xf32>
    %61 = arith.addf %59, %60 : vector<1x32xf32>
    %cst_54 = arith.constant dense<0.000000e+00> : vector<1x32xf32>
    %62 = tpu.matmul %37, %34, %cst_54 {dimension_numbers = #tpu.dot_dimension_numbers<[1], [0], [0], [1], [0, 0, 1, 1], [], []>} : vector<1x32xf32>, vector<32x32xf32>, vector<1x32xf32> -> vector<1x32xf32>
    %63 = arith.addf %62, %35 : vector<1x32xf32>
    %64 = arith.mulf %48, %63 : vector<1x32xf32>
    %65 = arith.addf %61, %64 : vector<1x32xf32>
    %66 = math.tanh %65 : vector<1x32xf32>
    %cst_55 = arith.constant 1.000000e+00 : f32
    %67 = vector.broadcast %cst_55 : f32 to vector<1x32xf32>
    %68 = arith.subf %67, %58 : vector<1x32xf32>
    %69 = arith.mulf %68, %66 : vector<1x32xf32>
    %70 = arith.mulf %58, %37 : vector<1x32xf32>
    %71 = arith.addf %69, %70 : vector<1x32xf32>
    %cst_56 = arith.constant dense<0.000000e+00> : vector<1x32xf32>
    %72 = tpu.matmul %71, %36, %cst_56 {dimension_numbers = #tpu.dot_dimension_numbers<[1], [0], [0], [1], [0, 0, 1, 1], [], []>} : vector<1x32xf32>, vector<32x32xf32>, vector<1x32xf32> -> vector<1x32xf32>
    %cst_57 = arith.constant dense<0.000000e+00> : vector<1x8xf32>
    %73 = tpu.matmul %72, %0, %cst_57 {dimension_numbers = #tpu.dot_dimension_numbers<[1], [1], [0], [0], [0, 0, 1, 0], [], []>} : vector<1x32xf32>, vector<8x32xf32>, vector<1x8xf32> -> vector<1x8xf32>
    %cst_58 = arith.constant dense<0xFF800000> : vector<1xf32>
    %74 = vector.multi_reduction <maximumf>, %73, %cst_58 [1] : vector<1x8xf32> to vector<1xf32>
    %75 = vector.shape_cast %74 : vector<1xf32> to vector<1x1xf32>
    %76 = vector.broadcast %75 : vector<1x1xf32> to vector<1x8xf32>
    %77 = arith.subf %73, %76 : vector<1x8xf32>
    %78 = math.exp %77 : vector<1x8xf32>
    %cst_59 = arith.constant dense<0.000000e+00> : vector<1xf32>
    %79 = vector.multi_reduction <add>, %78, %cst_59 [1] : vector<1x8xf32> to vector<1xf32>
    %80 = vector.shape_cast %79 : vector<1xf32> to vector<1x1xf32>
    %81 = tpu.reciprocal %80 : vector<1x1xf32> -> vector<1x1xf32>
    %82 = vector.broadcast %81 : vector<1x1xf32> to vector<1x8xf32>
    %83 = arith.mulf %78, %82 : vector<1x8xf32>
    %cst_60 = arith.constant dense<0.000000e+00> : vector<1x32xf32>
    %84 = tpu.matmul %83, %0, %cst_60 {dimension_numbers = #tpu.dot_dimension_numbers<[1], [0], [0], [1], [0, 0, 1, 1], [], []>} : vector<1x8xf32>, vector<8x32xf32>, vector<1x32xf32> -> vector<1x32xf32>
    %85 = vector.extract_strided_slice %8 {offsets = [1, 0], sizes = [1, 32], strides = [1, 1]} : vector<6x32xf32> to vector<1x32xf32>
    %cst_61 = arith.constant dense<0.000000e+00> : vector<1x32xf32>
    %86 = tpu.matmul %84, %24, %cst_61 {dimension_numbers = #tpu.dot_dimension_numbers<[1], [0], [0], [1], [0, 0, 1, 1], [], []>} : vector<1x32xf32>, vector<32x32xf32>, vector<1x32xf32> -> vector<1x32xf32>
    %87 = arith.addf %85, %86 : vector<1x32xf32>
    %cst_62 = arith.constant dense<0.000000e+00> : vector<1x32xf32>
    %88 = tpu.matmul %71, %30, %cst_62 {dimension_numbers = #tpu.dot_dimension_numbers<[1], [0], [0], [1], [0, 0, 1, 1], [], []>} : vector<1x32xf32>, vector<32x32xf32>, vector<1x32xf32> -> vector<1x32xf32>
    %89 = arith.addf %87, %88 : vector<1x32xf32>
    %90 = arith.negf %89 : vector<1x32xf32>
    %91 = math.exp %90 : vector<1x32xf32>
    %cst_63 = arith.constant 1.000000e+00 : f32
    %92 = vector.broadcast %cst_63 : f32 to vector<1x32xf32>
    %93 = arith.addf %92, %91 : vector<1x32xf32>
    %94 = arith.divf %92, %93 : vector<1x32xf32>
    %95 = vector.extract_strided_slice %15 {offsets = [1, 0], sizes = [1, 32], strides = [1, 1]} : vector<6x32xf32> to vector<1x32xf32>
    %cst_64 = arith.constant dense<0.000000e+00> : vector<1x32xf32>
    %96 = tpu.matmul %84, %26, %cst_64 {dimension_numbers = #tpu.dot_dimension_numbers<[1], [0], [0], [1], [0, 0, 1, 1], [], []>} : vector<1x32xf32>, vector<32x32xf32>, vector<1x32xf32> -> vector<1x32xf32>
    %97 = arith.addf %95, %96 : vector<1x32xf32>
    %cst_65 = arith.constant dense<0.000000e+00> : vector<1x32xf32>
    %98 = tpu.matmul %71, %32, %cst_65 {dimension_numbers = #tpu.dot_dimension_numbers<[1], [0], [0], [1], [0, 0, 1, 1], [], []>} : vector<1x32xf32>, vector<32x32xf32>, vector<1x32xf32> -> vector<1x32xf32>
    %99 = arith.addf %97, %98 : vector<1x32xf32>
    %100 = arith.negf %99 : vector<1x32xf32>
    %101 = math.exp %100 : vector<1x32xf32>
    %cst_66 = arith.constant 1.000000e+00 : f32
    %102 = vector.broadcast %cst_66 : f32 to vector<1x32xf32>
    %103 = arith.addf %102, %101 : vector<1x32xf32>
    %104 = arith.divf %102, %103 : vector<1x32xf32>
    %105 = vector.extract_strided_slice %22 {offsets = [1, 0], sizes = [1, 32], strides = [1, 1]} : vector<6x32xf32> to vector<1x32xf32>
    %cst_67 = arith.constant dense<0.000000e+00> : vector<1x32xf32>
    %106 = tpu.matmul %84, %28, %cst_67 {dimension_numbers = #tpu.dot_dimension_numbers<[1], [0], [0], [1], [0, 0, 1, 1], [], []>} : vector<1x32xf32>, vector<32x32xf32>, vector<1x32xf32> -> vector<1x32xf32>
    %107 = arith.addf %105, %106 : vector<1x32xf32>
    %cst_68 = arith.constant dense<0.000000e+00> : vector<1x32xf32>
    %108 = tpu.matmul %71, %34, %cst_68 {dimension_numbers = #tpu.dot_dimension_numbers<[1], [0], [0], [1], [0, 0, 1, 1], [], []>} : vector<1x32xf32>, vector<32x32xf32>, vector<1x32xf32> -> vector<1x32xf32>
    %109 = arith.addf %108, %35 : vector<1x32xf32>
    %110 = arith.mulf %94, %109 : vector<1x32xf32>
    %111 = arith.addf %107, %110 : vector<1x32xf32>
    %112 = math.tanh %111 : vector<1x32xf32>
    %cst_69 = arith.constant 1.000000e+00 : f32
    %113 = vector.broadcast %cst_69 : f32 to vector<1x32xf32>
    %114 = arith.subf %113, %104 : vector<1x32xf32>
    %115 = arith.mulf %114, %112 : vector<1x32xf32>
    %116 = arith.mulf %104, %71 : vector<1x32xf32>
    %117 = arith.addf %115, %116 : vector<1x32xf32>
    %cst_70 = arith.constant dense<0.000000e+00> : vector<1x32xf32>
    %118 = tpu.matmul %117, %36, %cst_70 {dimension_numbers = #tpu.dot_dimension_numbers<[1], [0], [0], [1], [0, 0, 1, 1], [], []>} : vector<1x32xf32>, vector<32x32xf32>, vector<1x32xf32> -> vector<1x32xf32>
    %cst_71 = arith.constant dense<0.000000e+00> : vector<1x8xf32>
    %119 = tpu.matmul %118, %0, %cst_71 {dimension_numbers = #tpu.dot_dimension_numbers<[1], [1], [0], [0], [0, 0, 1, 0], [], []>} : vector<1x32xf32>, vector<8x32xf32>, vector<1x8xf32> -> vector<1x8xf32>
    %cst_72 = arith.constant dense<0xFF800000> : vector<1xf32>
    %120 = vector.multi_reduction <maximumf>, %119, %cst_72 [1] : vector<1x8xf32> to vector<1xf32>
    %121 = vector.shape_cast %120 : vector<1xf32> to vector<1x1xf32>
    %122 = vector.broadcast %121 : vector<1x1xf32> to vector<1x8xf32>
    %123 = arith.subf %119, %122 : vector<1x8xf32>
    %124 = math.exp %123 : vector<1x8xf32>
    %cst_73 = arith.constant dense<0.000000e+00> : vector<1xf32>
    %125 = vector.multi_reduction <add>, %124, %cst_73 [1] : vector<1x8xf32> to vector<1xf32>
    %126 = vector.shape_cast %125 : vector<1xf32> to vector<1x1xf32>
    %127 = tpu.reciprocal %126 : vector<1x1xf32> -> vector<1x1xf32>
    %128 = vector.broadcast %127 : vector<1x1xf32> to vector<1x8xf32>
    %129 = arith.mulf %124, %128 : vector<1x8xf32>
    %cst_74 = arith.constant dense<0.000000e+00> : vector<1x32xf32>
    %130 = tpu.matmul %129, %0, %cst_74 {dimension_numbers = #tpu.dot_dimension_numbers<[1], [0], [0], [1], [0, 0, 1, 1], [], []>} : vector<1x8xf32>, vector<8x32xf32>, vector<1x32xf32> -> vector<1x32xf32>
    %131 = vector.extract_strided_slice %8 {offsets = [2, 0], sizes = [1, 32], strides = [1, 1]} : vector<6x32xf32> to vector<1x32xf32>
    %cst_75 = arith.constant dense<0.000000e+00> : vector<1x32xf32>
    %132 = tpu.matmul %130, %24, %cst_75 {dimension_numbers = #tpu.dot_dimension_numbers<[1], [0], [0], [1], [0, 0, 1, 1], [], []>} : vector<1x32xf32>, vector<32x32xf32>, vector<1x32xf32> -> vector<1x32xf32>
    %133 = arith.addf %131, %132 : vector<1x32xf32>
    %cst_76 = arith.constant dense<0.000000e+00> : vector<1x32xf32>
    %134 = tpu.matmul %117, %30, %cst_76 {dimension_numbers = #tpu.dot_dimension_numbers<[1], [0], [0], [1], [0, 0, 1, 1], [], []>} : vector<1x32xf32>, vector<32x32xf32>, vector<1x32xf32> -> vector<1x32xf32>
    %135 = arith.addf %133, %134 : vector<1x32xf32>
    %136 = arith.negf %135 : vector<1x32xf32>
    %137 = math.exp %136 : vector<1x32xf32>
    %cst_77 = arith.constant 1.000000e+00 : f32
    %138 = vector.broadcast %cst_77 : f32 to vector<1x32xf32>
    %139 = arith.addf %138, %137 : vector<1x32xf32>
    %140 = arith.divf %138, %139 : vector<1x32xf32>
    %141 = vector.extract_strided_slice %15 {offsets = [2, 0], sizes = [1, 32], strides = [1, 1]} : vector<6x32xf32> to vector<1x32xf32>
    %cst_78 = arith.constant dense<0.000000e+00> : vector<1x32xf32>
    %142 = tpu.matmul %130, %26, %cst_78 {dimension_numbers = #tpu.dot_dimension_numbers<[1], [0], [0], [1], [0, 0, 1, 1], [], []>} : vector<1x32xf32>, vector<32x32xf32>, vector<1x32xf32> -> vector<1x32xf32>
    %143 = arith.addf %141, %142 : vector<1x32xf32>
    %cst_79 = arith.constant dense<0.000000e+00> : vector<1x32xf32>
    %144 = tpu.matmul %117, %32, %cst_79 {dimension_numbers = #tpu.dot_dimension_numbers<[1], [0], [0], [1], [0, 0, 1, 1], [], []>} : vector<1x32xf32>, vector<32x32xf32>, vector<1x32xf32> -> vector<1x32xf32>
    %145 = arith.addf %143, %144 : vector<1x32xf32>
    %146 = arith.negf %145 : vector<1x32xf32>
    %147 = math.exp %146 : vector<1x32xf32>
    %cst_80 = arith.constant 1.000000e+00 : f32
    %148 = vector.broadcast %cst_80 : f32 to vector<1x32xf32>
    %149 = arith.addf %148, %147 : vector<1x32xf32>
    %150 = arith.divf %148, %149 : vector<1x32xf32>
    %151 = vector.extract_strided_slice %22 {offsets = [2, 0], sizes = [1, 32], strides = [1, 1]} : vector<6x32xf32> to vector<1x32xf32>
    %cst_81 = arith.constant dense<0.000000e+00> : vector<1x32xf32>
    %152 = tpu.matmul %130, %28, %cst_81 {dimension_numbers = #tpu.dot_dimension_numbers<[1], [0], [0], [1], [0, 0, 1, 1], [], []>} : vector<1x32xf32>, vector<32x32xf32>, vector<1x32xf32> -> vector<1x32xf32>
    %153 = arith.addf %151, %152 : vector<1x32xf32>
    %cst_82 = arith.constant dense<0.000000e+00> : vector<1x32xf32>
    %154 = tpu.matmul %117, %34, %cst_82 {dimension_numbers = #tpu.dot_dimension_numbers<[1], [0], [0], [1], [0, 0, 1, 1], [], []>} : vector<1x32xf32>, vector<32x32xf32>, vector<1x32xf32> -> vector<1x32xf32>
    %155 = arith.addf %154, %35 : vector<1x32xf32>
    %156 = arith.mulf %140, %155 : vector<1x32xf32>
    %157 = arith.addf %153, %156 : vector<1x32xf32>
    %158 = math.tanh %157 : vector<1x32xf32>
    %cst_83 = arith.constant 1.000000e+00 : f32
    %159 = vector.broadcast %cst_83 : f32 to vector<1x32xf32>
    %160 = arith.subf %159, %150 : vector<1x32xf32>
    %161 = arith.mulf %160, %158 : vector<1x32xf32>
    %162 = arith.mulf %150, %117 : vector<1x32xf32>
    %163 = arith.addf %161, %162 : vector<1x32xf32>
    %cst_84 = arith.constant dense<0.000000e+00> : vector<1x32xf32>
    %164 = tpu.matmul %163, %36, %cst_84 {dimension_numbers = #tpu.dot_dimension_numbers<[1], [0], [0], [1], [0, 0, 1, 1], [], []>} : vector<1x32xf32>, vector<32x32xf32>, vector<1x32xf32> -> vector<1x32xf32>
    %cst_85 = arith.constant dense<0.000000e+00> : vector<1x8xf32>
    %165 = tpu.matmul %164, %0, %cst_85 {dimension_numbers = #tpu.dot_dimension_numbers<[1], [1], [0], [0], [0, 0, 1, 0], [], []>} : vector<1x32xf32>, vector<8x32xf32>, vector<1x8xf32> -> vector<1x8xf32>
    %cst_86 = arith.constant dense<0xFF800000> : vector<1xf32>
    %166 = vector.multi_reduction <maximumf>, %165, %cst_86 [1] : vector<1x8xf32> to vector<1xf32>
    %167 = vector.shape_cast %166 : vector<1xf32> to vector<1x1xf32>
    %168 = vector.broadcast %167 : vector<1x1xf32> to vector<1x8xf32>
    %169 = arith.subf %165, %168 : vector<1x8xf32>
    %170 = math.exp %169 : vector<1x8xf32>
    %cst_87 = arith.constant dense<0.000000e+00> : vector<1xf32>
    %171 = vector.multi_reduction <add>, %170, %cst_87 [1] : vector<1x8xf32> to vector<1xf32>
    %172 = vector.shape_cast %171 : vector<1xf32> to vector<1x1xf32>
    %173 = tpu.reciprocal %172 : vector<1x1xf32> -> vector<1x1xf32>
    %174 = vector.broadcast %173 : vector<1x1xf32> to vector<1x8xf32>
    %175 = arith.mulf %170, %174 : vector<1x8xf32>
    %cst_88 = arith.constant dense<0.000000e+00> : vector<1x32xf32>
    %176 = tpu.matmul %175, %0, %cst_88 {dimension_numbers = #tpu.dot_dimension_numbers<[1], [0], [0], [1], [0, 0, 1, 1], [], []>} : vector<1x8xf32>, vector<8x32xf32>, vector<1x32xf32> -> vector<1x32xf32>
    %177 = vector.extract_strided_slice %8 {offsets = [3, 0], sizes = [1, 32], strides = [1, 1]} : vector<6x32xf32> to vector<1x32xf32>
    %cst_89 = arith.constant dense<0.000000e+00> : vector<1x32xf32>
    %178 = tpu.matmul %176, %24, %cst_89 {dimension_numbers = #tpu.dot_dimension_numbers<[1], [0], [0], [1], [0, 0, 1, 1], [], []>} : vector<1x32xf32>, vector<32x32xf32>, vector<1x32xf32> -> vector<1x32xf32>
    %179 = arith.addf %177, %178 : vector<1x32xf32>
    %cst_90 = arith.constant dense<0.000000e+00> : vector<1x32xf32>
    %180 = tpu.matmul %163, %30, %cst_90 {dimension_numbers = #tpu.dot_dimension_numbers<[1], [0], [0], [1], [0, 0, 1, 1], [], []>} : vector<1x32xf32>, vector<32x32xf32>, vector<1x32xf32> -> vector<1x32xf32>
    %181 = arith.addf %179, %180 : vector<1x32xf32>
    %182 = arith.negf %181 : vector<1x32xf32>
    %183 = math.exp %182 : vector<1x32xf32>
    %cst_91 = arith.constant 1.000000e+00 : f32
    %184 = vector.broadcast %cst_91 : f32 to vector<1x32xf32>
    %185 = arith.addf %184, %183 : vector<1x32xf32>
    %186 = arith.divf %184, %185 : vector<1x32xf32>
    %187 = vector.extract_strided_slice %15 {offsets = [3, 0], sizes = [1, 32], strides = [1, 1]} : vector<6x32xf32> to vector<1x32xf32>
    %cst_92 = arith.constant dense<0.000000e+00> : vector<1x32xf32>
    %188 = tpu.matmul %176, %26, %cst_92 {dimension_numbers = #tpu.dot_dimension_numbers<[1], [0], [0], [1], [0, 0, 1, 1], [], []>} : vector<1x32xf32>, vector<32x32xf32>, vector<1x32xf32> -> vector<1x32xf32>
    %189 = arith.addf %187, %188 : vector<1x32xf32>
    %cst_93 = arith.constant dense<0.000000e+00> : vector<1x32xf32>
    %190 = tpu.matmul %163, %32, %cst_93 {dimension_numbers = #tpu.dot_dimension_numbers<[1], [0], [0], [1], [0, 0, 1, 1], [], []>} : vector<1x32xf32>, vector<32x32xf32>, vector<1x32xf32> -> vector<1x32xf32>
    %191 = arith.addf %189, %190 : vector<1x32xf32>
    %192 = arith.negf %191 : vector<1x32xf32>
    %193 = math.exp %192 : vector<1x32xf32>
    %cst_94 = arith.constant 1.000000e+00 : f32
    %194 = vector.broadcast %cst_94 : f32 to vector<1x32xf32>
    %195 = arith.addf %194, %193 : vector<1x32xf32>
    %196 = arith.divf %194, %195 : vector<1x32xf32>
    %197 = vector.extract_strided_slice %22 {offsets = [3, 0], sizes = [1, 32], strides = [1, 1]} : vector<6x32xf32> to vector<1x32xf32>
    %cst_95 = arith.constant dense<0.000000e+00> : vector<1x32xf32>
    %198 = tpu.matmul %176, %28, %cst_95 {dimension_numbers = #tpu.dot_dimension_numbers<[1], [0], [0], [1], [0, 0, 1, 1], [], []>} : vector<1x32xf32>, vector<32x32xf32>, vector<1x32xf32> -> vector<1x32xf32>
    %199 = arith.addf %197, %198 : vector<1x32xf32>
    %cst_96 = arith.constant dense<0.000000e+00> : vector<1x32xf32>
    %200 = tpu.matmul %163, %34, %cst_96 {dimension_numbers = #tpu.dot_dimension_numbers<[1], [0], [0], [1], [0, 0, 1, 1], [], []>} : vector<1x32xf32>, vector<32x32xf32>, vector<1x32xf32> -> vector<1x32xf32>
    %201 = arith.addf %200, %35 : vector<1x32xf32>
    %202 = arith.mulf %186, %201 : vector<1x32xf32>
    %203 = arith.addf %199, %202 : vector<1x32xf32>
    %204 = math.tanh %203 : vector<1x32xf32>
    %cst_97 = arith.constant 1.000000e+00 : f32
    %205 = vector.broadcast %cst_97 : f32 to vector<1x32xf32>
    %206 = arith.subf %205, %196 : vector<1x32xf32>
    %207 = arith.mulf %206, %204 : vector<1x32xf32>
    %208 = arith.mulf %196, %163 : vector<1x32xf32>
    %209 = arith.addf %207, %208 : vector<1x32xf32>
    %cst_98 = arith.constant dense<0.000000e+00> : vector<1x32xf32>
    %210 = tpu.matmul %209, %36, %cst_98 {dimension_numbers = #tpu.dot_dimension_numbers<[1], [0], [0], [1], [0, 0, 1, 1], [], []>} : vector<1x32xf32>, vector<32x32xf32>, vector<1x32xf32> -> vector<1x32xf32>
    %cst_99 = arith.constant dense<0.000000e+00> : vector<1x8xf32>
    %211 = tpu.matmul %210, %0, %cst_99 {dimension_numbers = #tpu.dot_dimension_numbers<[1], [1], [0], [0], [0, 0, 1, 0], [], []>} : vector<1x32xf32>, vector<8x32xf32>, vector<1x8xf32> -> vector<1x8xf32>
    %cst_100 = arith.constant dense<0xFF800000> : vector<1xf32>
    %212 = vector.multi_reduction <maximumf>, %211, %cst_100 [1] : vector<1x8xf32> to vector<1xf32>
    %213 = vector.shape_cast %212 : vector<1xf32> to vector<1x1xf32>
    %214 = vector.broadcast %213 : vector<1x1xf32> to vector<1x8xf32>
    %215 = arith.subf %211, %214 : vector<1x8xf32>
    %216 = math.exp %215 : vector<1x8xf32>
    %cst_101 = arith.constant dense<0.000000e+00> : vector<1xf32>
    %217 = vector.multi_reduction <add>, %216, %cst_101 [1] : vector<1x8xf32> to vector<1xf32>
    %218 = vector.shape_cast %217 : vector<1xf32> to vector<1x1xf32>
    %219 = tpu.reciprocal %218 : vector<1x1xf32> -> vector<1x1xf32>
    %220 = vector.broadcast %219 : vector<1x1xf32> to vector<1x8xf32>
    %221 = arith.mulf %216, %220 : vector<1x8xf32>
    %cst_102 = arith.constant dense<0.000000e+00> : vector<1x32xf32>
    %222 = tpu.matmul %221, %0, %cst_102 {dimension_numbers = #tpu.dot_dimension_numbers<[1], [0], [0], [1], [0, 0, 1, 1], [], []>} : vector<1x8xf32>, vector<8x32xf32>, vector<1x32xf32> -> vector<1x32xf32>
    %223 = vector.extract_strided_slice %8 {offsets = [4, 0], sizes = [1, 32], strides = [1, 1]} : vector<6x32xf32> to vector<1x32xf32>
    %cst_103 = arith.constant dense<0.000000e+00> : vector<1x32xf32>
    %224 = tpu.matmul %222, %24, %cst_103 {dimension_numbers = #tpu.dot_dimension_numbers<[1], [0], [0], [1], [0, 0, 1, 1], [], []>} : vector<1x32xf32>, vector<32x32xf32>, vector<1x32xf32> -> vector<1x32xf32>
    %225 = arith.addf %223, %224 : vector<1x32xf32>
    %cst_104 = arith.constant dense<0.000000e+00> : vector<1x32xf32>
    %226 = tpu.matmul %209, %30, %cst_104 {dimension_numbers = #tpu.dot_dimension_numbers<[1], [0], [0], [1], [0, 0, 1, 1], [], []>} : vector<1x32xf32>, vector<32x32xf32>, vector<1x32xf32> -> vector<1x32xf32>
    %227 = arith.addf %225, %226 : vector<1x32xf32>
    %228 = arith.negf %227 : vector<1x32xf32>
    %229 = math.exp %228 : vector<1x32xf32>
    %cst_105 = arith.constant 1.000000e+00 : f32
    %230 = vector.broadcast %cst_105 : f32 to vector<1x32xf32>
    %231 = arith.addf %230, %229 : vector<1x32xf32>
    %232 = arith.divf %230, %231 : vector<1x32xf32>
    %233 = vector.extract_strided_slice %15 {offsets = [4, 0], sizes = [1, 32], strides = [1, 1]} : vector<6x32xf32> to vector<1x32xf32>
    %cst_106 = arith.constant dense<0.000000e+00> : vector<1x32xf32>
    %234 = tpu.matmul %222, %26, %cst_106 {dimension_numbers = #tpu.dot_dimension_numbers<[1], [0], [0], [1], [0, 0, 1, 1], [], []>} : vector<1x32xf32>, vector<32x32xf32>, vector<1x32xf32> -> vector<1x32xf32>
    %235 = arith.addf %233, %234 : vector<1x32xf32>
    %cst_107 = arith.constant dense<0.000000e+00> : vector<1x32xf32>
    %236 = tpu.matmul %209, %32, %cst_107 {dimension_numbers = #tpu.dot_dimension_numbers<[1], [0], [0], [1], [0, 0, 1, 1], [], []>} : vector<1x32xf32>, vector<32x32xf32>, vector<1x32xf32> -> vector<1x32xf32>
    %237 = arith.addf %235, %236 : vector<1x32xf32>
    %238 = arith.negf %237 : vector<1x32xf32>
    %239 = math.exp %238 : vector<1x32xf32>
    %cst_108 = arith.constant 1.000000e+00 : f32
    %240 = vector.broadcast %cst_108 : f32 to vector<1x32xf32>
    %241 = arith.addf %240, %239 : vector<1x32xf32>
    %242 = arith.divf %240, %241 : vector<1x32xf32>
    %243 = vector.extract_strided_slice %22 {offsets = [4, 0], sizes = [1, 32], strides = [1, 1]} : vector<6x32xf32> to vector<1x32xf32>
    %cst_109 = arith.constant dense<0.000000e+00> : vector<1x32xf32>
    %244 = tpu.matmul %222, %28, %cst_109 {dimension_numbers = #tpu.dot_dimension_numbers<[1], [0], [0], [1], [0, 0, 1, 1], [], []>} : vector<1x32xf32>, vector<32x32xf32>, vector<1x32xf32> -> vector<1x32xf32>
    %245 = arith.addf %243, %244 : vector<1x32xf32>
    %cst_110 = arith.constant dense<0.000000e+00> : vector<1x32xf32>
    %246 = tpu.matmul %209, %34, %cst_110 {dimension_numbers = #tpu.dot_dimension_numbers<[1], [0], [0], [1], [0, 0, 1, 1], [], []>} : vector<1x32xf32>, vector<32x32xf32>, vector<1x32xf32> -> vector<1x32xf32>
    %247 = arith.addf %246, %35 : vector<1x32xf32>
    %248 = arith.mulf %232, %247 : vector<1x32xf32>
    %249 = arith.addf %245, %248 : vector<1x32xf32>
    %250 = math.tanh %249 : vector<1x32xf32>
    %cst_111 = arith.constant 1.000000e+00 : f32
    %251 = vector.broadcast %cst_111 : f32 to vector<1x32xf32>
    %252 = arith.subf %251, %242 : vector<1x32xf32>
    %253 = arith.mulf %252, %250 : vector<1x32xf32>
    %254 = arith.mulf %242, %209 : vector<1x32xf32>
    %255 = arith.addf %253, %254 : vector<1x32xf32>
    %cst_112 = arith.constant dense<0.000000e+00> : vector<1x32xf32>
    %256 = tpu.matmul %255, %36, %cst_112 {dimension_numbers = #tpu.dot_dimension_numbers<[1], [0], [0], [1], [0, 0, 1, 1], [], []>} : vector<1x32xf32>, vector<32x32xf32>, vector<1x32xf32> -> vector<1x32xf32>
    %cst_113 = arith.constant dense<0.000000e+00> : vector<1x8xf32>
    %257 = tpu.matmul %256, %0, %cst_113 {dimension_numbers = #tpu.dot_dimension_numbers<[1], [1], [0], [0], [0, 0, 1, 0], [], []>} : vector<1x32xf32>, vector<8x32xf32>, vector<1x8xf32> -> vector<1x8xf32>
    %cst_114 = arith.constant dense<0xFF800000> : vector<1xf32>
    %258 = vector.multi_reduction <maximumf>, %257, %cst_114 [1] : vector<1x8xf32> to vector<1xf32>
    %259 = vector.shape_cast %258 : vector<1xf32> to vector<1x1xf32>
    %260 = vector.broadcast %259 : vector<1x1xf32> to vector<1x8xf32>
    %261 = arith.subf %257, %260 : vector<1x8xf32>
    %262 = math.exp %261 : vector<1x8xf32>
    %cst_115 = arith.constant dense<0.000000e+00> : vector<1xf32>
    %263 = vector.multi_reduction <add>, %262, %cst_115 [1] : vector<1x8xf32> to vector<1xf32>
    %264 = vector.shape_cast %263 : vector<1xf32> to vector<1x1xf32>
    %265 = tpu.reciprocal %264 : vector<1x1xf32> -> vector<1x1xf32>
    %266 = vector.broadcast %265 : vector<1x1xf32> to vector<1x8xf32>
    %267 = arith.mulf %262, %266 : vector<1x8xf32>
    %cst_116 = arith.constant dense<0.000000e+00> : vector<1x32xf32>
    %268 = tpu.matmul %267, %0, %cst_116 {dimension_numbers = #tpu.dot_dimension_numbers<[1], [0], [0], [1], [0, 0, 1, 1], [], []>} : vector<1x8xf32>, vector<8x32xf32>, vector<1x32xf32> -> vector<1x32xf32>
    %269 = vector.extract_strided_slice %8 {offsets = [5, 0], sizes = [1, 32], strides = [1, 1]} : vector<6x32xf32> to vector<1x32xf32>
    %cst_117 = arith.constant dense<0.000000e+00> : vector<1x32xf32>
    %270 = tpu.matmul %268, %24, %cst_117 {dimension_numbers = #tpu.dot_dimension_numbers<[1], [0], [0], [1], [0, 0, 1, 1], [], []>} : vector<1x32xf32>, vector<32x32xf32>, vector<1x32xf32> -> vector<1x32xf32>
    %271 = arith.addf %269, %270 : vector<1x32xf32>
    %cst_118 = arith.constant dense<0.000000e+00> : vector<1x32xf32>
    %272 = tpu.matmul %255, %30, %cst_118 {dimension_numbers = #tpu.dot_dimension_numbers<[1], [0], [0], [1], [0, 0, 1, 1], [], []>} : vector<1x32xf32>, vector<32x32xf32>, vector<1x32xf32> -> vector<1x32xf32>
    %273 = arith.addf %271, %272 : vector<1x32xf32>
    %274 = arith.negf %273 : vector<1x32xf32>
    %275 = math.exp %274 : vector<1x32xf32>
    %cst_119 = arith.constant 1.000000e+00 : f32
    %276 = vector.broadcast %cst_119 : f32 to vector<1x32xf32>
    %277 = arith.addf %276, %275 : vector<1x32xf32>
    %278 = arith.divf %276, %277 : vector<1x32xf32>
    %279 = vector.extract_strided_slice %15 {offsets = [5, 0], sizes = [1, 32], strides = [1, 1]} : vector<6x32xf32> to vector<1x32xf32>
    %cst_120 = arith.constant dense<0.000000e+00> : vector<1x32xf32>
    %280 = tpu.matmul %268, %26, %cst_120 {dimension_numbers = #tpu.dot_dimension_numbers<[1], [0], [0], [1], [0, 0, 1, 1], [], []>} : vector<1x32xf32>, vector<32x32xf32>, vector<1x32xf32> -> vector<1x32xf32>
    %281 = arith.addf %279, %280 : vector<1x32xf32>
    %cst_121 = arith.constant dense<0.000000e+00> : vector<1x32xf32>
    %282 = tpu.matmul %255, %32, %cst_121 {dimension_numbers = #tpu.dot_dimension_numbers<[1], [0], [0], [1], [0, 0, 1, 1], [], []>} : vector<1x32xf32>, vector<32x32xf32>, vector<1x32xf32> -> vector<1x32xf32>
    %283 = arith.addf %281, %282 : vector<1x32xf32>
    %284 = arith.negf %283 : vector<1x32xf32>
    %285 = math.exp %284 : vector<1x32xf32>
    %cst_122 = arith.constant 1.000000e+00 : f32
    %286 = vector.broadcast %cst_122 : f32 to vector<1x32xf32>
    %287 = arith.addf %286, %285 : vector<1x32xf32>
    %288 = arith.divf %286, %287 : vector<1x32xf32>
    %289 = vector.extract_strided_slice %22 {offsets = [5, 0], sizes = [1, 32], strides = [1, 1]} : vector<6x32xf32> to vector<1x32xf32>
    %cst_123 = arith.constant dense<0.000000e+00> : vector<1x32xf32>
    %290 = tpu.matmul %268, %28, %cst_123 {dimension_numbers = #tpu.dot_dimension_numbers<[1], [0], [0], [1], [0, 0, 1, 1], [], []>} : vector<1x32xf32>, vector<32x32xf32>, vector<1x32xf32> -> vector<1x32xf32>
    %291 = arith.addf %289, %290 : vector<1x32xf32>
    %cst_124 = arith.constant dense<0.000000e+00> : vector<1x32xf32>
    %292 = tpu.matmul %255, %34, %cst_124 {dimension_numbers = #tpu.dot_dimension_numbers<[1], [0], [0], [1], [0, 0, 1, 1], [], []>} : vector<1x32xf32>, vector<32x32xf32>, vector<1x32xf32> -> vector<1x32xf32>
    %293 = arith.addf %292, %35 : vector<1x32xf32>
    %294 = arith.mulf %278, %293 : vector<1x32xf32>
    %295 = arith.addf %291, %294 : vector<1x32xf32>
    %296 = math.tanh %295 : vector<1x32xf32>
    %cst_125 = arith.constant 1.000000e+00 : f32
    %297 = vector.broadcast %cst_125 : f32 to vector<1x32xf32>
    %298 = arith.subf %297, %288 : vector<1x32xf32>
    %299 = arith.mulf %298, %296 : vector<1x32xf32>
    %300 = arith.mulf %288, %255 : vector<1x32xf32>
    %301 = arith.addf %299, %300 : vector<1x32xf32>
    %cst_126 = arith.constant dense<0.000000e+00> : vector<1x32xf32>
    %302 = tpu.matmul %301, %36, %cst_126 {dimension_numbers = #tpu.dot_dimension_numbers<[1], [0], [0], [1], [0, 0, 1, 1], [], []>} : vector<1x32xf32>, vector<32x32xf32>, vector<1x32xf32> -> vector<1x32xf32>
    %cst_127 = arith.constant dense<0.000000e+00> : vector<1x8xf32>
    %303 = tpu.matmul %302, %0, %cst_127 {dimension_numbers = #tpu.dot_dimension_numbers<[1], [1], [0], [0], [0, 0, 1, 0], [], []>} : vector<1x32xf32>, vector<8x32xf32>, vector<1x8xf32> -> vector<1x8xf32>
    %cst_128 = arith.constant dense<0xFF800000> : vector<1xf32>
    %304 = vector.multi_reduction <maximumf>, %303, %cst_128 [1] : vector<1x8xf32> to vector<1xf32>
    %305 = vector.shape_cast %304 : vector<1xf32> to vector<1x1xf32>
    %306 = vector.broadcast %305 : vector<1x1xf32> to vector<1x8xf32>
    %307 = arith.subf %303, %306 : vector<1x8xf32>
    %308 = math.exp %307 : vector<1x8xf32>
    %cst_129 = arith.constant dense<0.000000e+00> : vector<1xf32>
    %309 = vector.multi_reduction <add>, %308, %cst_129 [1] : vector<1x8xf32> to vector<1xf32>
    %310 = vector.shape_cast %309 : vector<1xf32> to vector<1x1xf32>
    %311 = tpu.reciprocal %310 : vector<1x1xf32> -> vector<1x1xf32>
    %312 = vector.broadcast %311 : vector<1x1xf32> to vector<1x8xf32>
    %313 = arith.mulf %308, %312 : vector<1x8xf32>
    %cst_130 = arith.constant dense<0.000000e+00> : vector<1x32xf32>
    %314 = tpu.matmul %313, %0, %cst_130 {dimension_numbers = #tpu.dot_dimension_numbers<[1], [0], [0], [1], [0, 0, 1, 1], [], []>} : vector<1x8xf32>, vector<8x32xf32>, vector<1x32xf32> -> vector<1x32xf32>
    %315 = tpu.concatenate %71, %117, %163, %209, %255, %301 in 0 : vector<1x32xf32>, vector<1x32xf32>, vector<1x32xf32>, vector<1x32xf32>, vector<1x32xf32>, vector<1x32xf32> -> vector<6x32xf32>
    %316 = tpu.concatenate %84, %130, %176, %222, %268, %314 in 0 : vector<1x32xf32>, vector<1x32xf32>, vector<1x32xf32>, vector<1x32xf32>, vector<1x32xf32>, vector<1x32xf32> -> vector<6x32xf32>
    %317 = tpu.concatenate %83, %129, %175, %221, %267, %313 in 0 : vector<1x8xf32>, vector<1x8xf32>, vector<1x8xf32>, vector<1x8xf32>, vector<1x8xf32>, vector<1x8xf32> -> vector<6x8xf32>
    %c0_131 = arith.constant 0 : index
    %c0_132 = arith.constant 0 : index
    %318 = vector.load %arg10[%c0_131, %c0_132] : memref<32x50xf32, #tpu.memory_space<vmem>>, vector<32x50xf32>
    %cst_133 = arith.constant dense<0.000000e+00> : vector<6x50xf32>
    %319 = tpu.matmul %315, %318, %cst_133 {dimension_numbers = #tpu.dot_dimension_numbers<[1], [0], [0], [1], [0, 0, 1, 1], [], []>} : vector<6x32xf32>, vector<32x50xf32>, vector<6x50xf32> -> vector<6x50xf32>
    %c0_134 = arith.constant 0 : index
    %c0_135 = arith.constant 0 : index
    %320 = vector.load %arg11[%c0_134, %c0_135] : memref<32x50xf32, #tpu.memory_space<vmem>>, vector<32x50xf32>
    %cst_136 = arith.constant dense<0.000000e+00> : vector<6x50xf32>
    %321 = tpu.matmul %316, %320, %cst_136 {dimension_numbers = #tpu.dot_dimension_numbers<[1], [0], [0], [1], [0, 0, 1, 1], [], []>} : vector<6x32xf32>, vector<32x50xf32>, vector<6x50xf32> -> vector<6x50xf32>
    %322 = arith.addf %319, %321 : vector<6x50xf32>
    %c0_137 = arith.constant 0 : index
    %c0_138 = arith.constant 0 : index
    %323 = vector.load %arg12[%c0_137, %c0_138] : memref<1x50xf32, #tpu.memory_space<vmem>>, vector<1x50xf32>
    %324 = vector.broadcast %323 : vector<1x50xf32> to vector<6x50xf32>
    %325 = arith.addf %322, %324 : vector<6x50xf32>
    %cst_139 = arith.constant dense<0xFF800000> : vector<6xf32>
    %326 = vector.multi_reduction <maximumf>, %325, %cst_139 [1] : vector<6x50xf32> to vector<6xf32>
    %327 = vector.shape_cast %326 : vector<6xf32> to vector<6x1xf32>
    %328 = vector.broadcast %327 : vector<6x1xf32> to vector<6x50xf32>
    %329 = arith.subf %325, %328 : vector<6x50xf32>
    %330 = math.exp %329 : vector<6x50xf32>
    %cst_140 = arith.constant dense<0.000000e+00> : vector<6xf32>
    %331 = vector.multi_reduction <add>, %330, %cst_140 [1] : vector<6x50xf32> to vector<6xf32>
    %332 = vector.shape_cast %331 : vector<6xf32> to vector<6x1xf32>
    %333 = math.log %332 : vector<6x1xf32>
    %334 = vector.broadcast %333 : vector<6x1xf32> to vector<6x50xf32>
    %335 = arith.subf %329, %334 : vector<6x50xf32>
    %c0_141 = arith.constant 0 : index
    %c0_142 = arith.constant 0 : index
    %336 = vector.load %arg13[%c0_141, %c0_142] : memref<6x50xf32, #tpu.memory_space<vmem>>, vector<6x50xf32>
    tpu.vector_store %arg13[%c0_141, %c0_142], %335 {strides = array<i32>} : memref<6x50xf32, #tpu.memory_space<vmem>>, vector<6x50xf32>,
    %c0_143 = arith.constant 0 : index
    %c0_144 = arith.constant 0 : index
    %337 = vector.load %arg14[%c0_143, %c0_144] : memref<6x32xf32, #tpu.memory_space<vmem>>, vector<6x32xf32>
    tpu.vector_store %arg14[%c0_143, %c0_144], %316 {strides = array<i32>} : memref<6x32xf32, #tpu.memory_space<vmem>>, vector<6x32xf32>,
    %c0_145 = arith.constant 0 : index
    %c0_146 = arith.constant 0 : index
    %338 = vector.load %arg15[%c0_145, %c0_146] : memref<6x32xf32, #tpu.memory_space<vmem>>, vector<6x32xf32>
    tpu.vector_store %arg15[%c0_145, %c0_146], %315 {strides = array<i32>} : memref<6x32xf32, #tpu.memory_space<vmem>>, vector<6x32xf32>,
    %c0_147 = arith.constant 0 : index
    %c0_148 = arith.constant 0 : index
    %339 = vector.load %arg16[%c0_147, %c0_148] : memref<6x8xf32, #tpu.memory_space<vmem>>, vector<6x8xf32>
    tpu.vector_store %arg16[%c0_147, %c0_148], %317 {strides = array<i32>} : memref<6x8xf32, #tpu.memory_space<vmem>>, vector<6x8xf32>,
    return
  }
}

</mosaic_0001>

<bundles_post_ra>
// kernel: decode_steps.1
= control target key start
LH: loop header
LB: loop body
LE: loop exit
PB: predicated region body
PF: predicated region fallthrough
CT: control target
= control target key end

     0   :  { %s7383_s0 = inlined_call_operand.vmem [shape: f32[6,32], index: 0, kind: input, shape index: {}]   ;;  %s7384_s1 = inlined_call_operand.hbm [shape: f32[1,32], index: 1, kind: input, shape index: {}]   ;;  %s7385_s2 = inlined_call_operand.hbm [shape: f32[1,32], index: 2, kind: input, shape index: {}]   ;;  %s7386_s3 = inlined_call_operand.hbm [shape: f32[8,32], index: 3, kind: input, shape index: {}]   ;;  %s7387_s4 = inlined_call_operand.vmem [shape: f32[3,32,32], index: 4, kind: input, shape index: {}]   ;;  %s7388_s5 = inlined_call_operand.vmem [shape: f32[3,32,32], index: 5, kind: input, shape index: {}]   ;;  %s7389_s6 = inlined_call_operand.hbm [shape: f32[3,32,32], index: 6, kind: input, shape index: {}]   ;;  %s7390_s7 = inlined_call_operand.vmem [shape: f32[3,1,32], index: 7, kind: input, shape index: {}]   ;;  %s7391_s8 = inlined_call_operand.vmem [shape: f32[1,32], index: 8, kind: input, shape index: {}]   ;;  %s7392_s9 = inlined_call_operand.hbm [shape: f32[32,32], index: 9, kind: input, shape index: {}]   ;;  %s7393_s10 = inlined_call_operand.hbm [shape: f32[32,50], index: 10, kind: input, shape index: {}]   ;;  %s7394_s11 = inlined_call_operand.hbm [shape: f32[32,50], index: 11, kind: input, shape index: {}]   ;;  %s7395_s12 = inlined_call_operand.vmem [shape: f32[1,50], index: 12, kind: input, shape index: {}]   ;;  %s7396_s13 = inlined_call_operand.hbm [shape: f32[6,50], index: 13, kind: output, shape index: {0}]   ;;  %s7397_s14 = inlined_call_operand.hbm [shape: f32[6,32], index: 14, kind: output, shape index: {1}]   ;;  %s7398_s15 = inlined_call_operand.hbm [shape: f32[6,32], index: 15, kind: output, shape index: {2}]   ;;  %s7399_s16 = inlined_call_operand.hbm [shape: f32[6,8], index: 16, kind: output, shape index: {3}]  }
   0x1   :  { %7400 = sst [smem:[#allocation27_spill]] %s7383_s0 }
   0x2   :  { %22 = vsyncpa [#allocation3], 0 }
   0x3   :  { %23 = vsyncpa [#allocation6], 0 }
   0x4   :  { %24 = vsyncpa [#allocation9], 0 }
   0x5   :  { %25 = vsyncpa [#allocation12], 0 }
   0x6   :  { %26 = vsyncpa [#allocation4], 0 }
   0x7   :  { %27 = vsyncpa [#allocation16], 0 }
   0x8   :  { %28 = vsyncpa [#allocation19], 0  ;;  %s6469_s21 = smov [#allocation5]   ;;  %s6470_s23 = smov [#allocation8]  }
   0x9   :  { %s47_s22 = sshll.u32 %s6469_s21, 4  ;;  %s70_s24 = sshll.u32 %s6470_s23, 4  ;;  %s48_s22 = int_to_ptr.vmem [resolvable:$true] %s47_s22  ;;  %s6570_s24 = int_to_ptr.vmem [resolvable:$true] %s70_s24 }
   0xa   :  { %s6213_s27 = scalar_lea.hbm %s7385_s2, 16 }
   0xb   :  { %p6214_p0 = scmp.ne.s32.totalorder %s7385_s2, %s6213_s27  ;;  %p6217_p1 = scmp.lt.u32.totalorder %s6213_s27, %s7385_s2 }
   0xd   :  { %p6219_p2 = pnand %p6217_p1, %p6214_p0 }
   0xf   :  { %6222 = shalt.err (!%p6219_p2)
}
  0x10   :  { %s6223_s17 = scalar_lea.vmem %s48_s22, 16  ;;  %s6227_s18 = scalar_lea.vmem %s48_s22, 32 }
  0x11   :  { %p6224_p3 = scmp.ne.s32.totalorder %s48_s22, %s6223_s17  ;;  %p6228_p4 = scmp.lt.s32.totalorder %s48_s22, %s48_s22 }
  0x12   :  { %p6229_p5 = scmp.lt.s32.totalorder %s6227_s18, %s6223_s17 }
  0x14   :  { %p6230_p6 = por %p6229_p5, %p6228_p4 }
  0x16   :  { %p6231_p7 = pnand %p6230_p6, %p6224_p3 }
  0x18   :  { %6234 = shalt.err (!%p6231_p7)
}
  0x19   :  { %50 = dma.hbm_to_vmem [thread:$0]  %s7385_s2, 16, %s48_s22, [#allocation6]  }
  0x1a   :  { %s6235_s25 = scalar_lea.hbm %s7389_s6, 1536 }
  0x1b   :  { %p6236_p8 = scmp.ne.s32.totalorder %s7389_s6, %s6235_s25  ;;  %p6239_p9 = scmp.lt.u32.totalorder %s6235_s25, %s7389_s6 }
  0x1d   :  { %p6241_p10 = pnand %p6239_p9, %p6236_p8 }
  0x1f   :  { %6244 = shalt.err (!%p6241_p10)
}
  0x20   :  { %s6245_s30 = scalar_lea.vmem %s6570_s24, 1536  ;;  %p6250_p12 = scmp.lt.s32.totalorder %s6570_s24, %s6570_s24 }
  0x21   :  { %p6246_p11 = scmp.ne.s32.totalorder %s6570_s24, %s6245_s30  ;;  %p6251_p13 = scmp.lt.s32.totalorder %s6245_s30, %s6245_s30 }
  0x23   :  { %p6252_p0 = por %p6251_p13, %p6250_p12 }
  0x25   :  { %p6253_p1 = pnand %p6252_p0, %p6246_p11 }
  0x27   :  { %6256 = shalt.err (!%p6253_p1)
}
  0x28   :  { %s6471_s2 = smov 128   ;;  %s6472_s22 = smov 8  }
  0x29   :  { %76 = dma.hbm_to_vmem [thread:$0]  %s7389_s6, 1536, %s6570_s24, [#allocation9], %s6471_s2, %s6471_s2, %s6472_s22  }
  0x2a   :  { %s6473_s18 = smov [#allocation11]   ;;  %s6474_s20 = smov [#allocation2]  }
  0x2b   :  { %s98_s19 = sshll.u32 %s6473_s18, 4  ;;  %s37_s21 = sshll.u32 %s6474_s20, 4  ;;  %s99_s19 = int_to_ptr.vmem [resolvable:$true] %s98_s19  ;;  %s38_s21 = int_to_ptr.vmem [resolvable:$true] %s37_s21 }
  0x2c   :  { %s6257_s26 = scalar_lea.hbm %s7393_s10, 512 }
  0x2d   :  { %p6258_p2 = scmp.ne.s32.totalorder %s7393_s10, %s6257_s26  ;;  %p6261_p3 = scmp.lt.u32.totalorder %s6257_s26, %s7393_s10 }
  0x2f   :  { %p6263_p4 = pnand %p6261_p3, %p6258_p2 }
  0x31   :  { %6266 = shalt.err (!%p6263_p4)
}
  0x32   :  { %s6267_s6 = scalar_lea.vmem %s99_s19, 512  ;;  %p6272_p6 = scmp.lt.s32.totalorder %s99_s19, %s99_s19 }
  0x33   :  { %p6268_p5 = scmp.ne.s32.totalorder %s99_s19, %s6267_s6  ;;  %p6273_p7 = scmp.lt.s32.totalorder %s6267_s6, %s6267_s6 }
  0x35   :  { %p6274_p8 = por %p6273_p7, %p6272_p6 }
  0x37   :  { %p6275_p9 = pnand %p6274_p8, %p6268_p5 }
  0x39   :  { %6278 = shalt.err (!%p6275_p9)
}
  0x3a   :  { %104 = dma.hbm_to_vmem [thread:$0]  %s7393_s10, 512, %s99_s19, [#allocation12], %s6471_s2, %s6471_s2, %s6472_s22  }
  0x3b   :  { %s6279_s20 = scalar_lea.hbm %s7384_s1, 16 }
  0x3c   :  { %p6280_p10 = scmp.ne.s32.totalorder %s7384_s1, %s6279_s20  ;;  %p6283_p11 = scmp.lt.u32.totalorder %s6279_s20, %s7384_s1 }
  0x3e   :  { %p6285_p12 = pnand %p6283_p11, %p6280_p10 }
  0x40   :  { %6288 = shalt.err (!%p6285_p12)
}
  0x41   :  { %s6289_s28 = scalar_lea.vmem %s38_s21, 16  ;;  %s6293_s29 = scalar_lea.vmem %s38_s21, 32 }
  0x42   :  { %p6290_p13 = scmp.ne.s32.totalorder %s38_s21, %s6289_s28  ;;  %p6294_p0 = scmp.lt.s32.totalorder %s38_s21, %s38_s21 }
  0x43   :  { %p6295_p1 = scmp.lt.s32.totalorder %s6293_s29, %s6289_s28 }
  0x45   :  { %p6296_p2 = por %p6295_p1, %p6294_p0 }
  0x47   :  { %p6297_p3 = pnand %p6296_p2, %p6290_p13 }
  0x49   :  { %6300 = shalt.err (!%p6297_p3)
}
  0x4a   :  { %40 = dma.hbm_to_vmem [thread:$0]  %s7384_s1, 16, %s38_s21, [#allocation3]  }
  0x4b   :  { %s6475_s30 = smov [#allocation7]   ;;  %s6476_s24 = smov [#allocation10]  }
  0x4c   :  { %s57_s6 = sshll.u32 %s6475_s30, 4  ;;  %s86_s0 = sshll.u32 %s6476_s24, 4  ;;  %s58_s6 = int_to_ptr.vmem [resolvable:$true] %s57_s6  ;;  %s6631_s0 = int_to_ptr.vmem [resolvable:$true] %s86_s0 }
  0x4d   :  { %s6301_s20 = scalar_lea.hbm %s7386_s3, 128 }
  0x4e   :  { %p6302_p4 = scmp.ne.s32.totalorder %s7386_s3, %s6301_s20  ;;  %p6305_p5 = scmp.lt.u32.totalorder %s6301_s20, %s7386_s3 }
  0x50   :  { %p6307_p6 = pnand %p6305_p5, %p6302_p4 }
  0x52   :  { %6310 = shalt.err (!%p6307_p6)
}
  0x53   :  { %s6311_s1 = scalar_lea.vmem %s58_s6, 128  ;;  %p6316_p8 = scmp.lt.s32.totalorder %s58_s6, %s58_s6 }
  0x54   :  { %p6312_p7 = scmp.ne.s32.totalorder %s58_s6, %s6311_s1  ;;  %p6317_p9 = scmp.lt.s32.totalorder %s6311_s1, %s6311_s1 }
  0x56   :  { %p6318_p10 = por %p6317_p9, %p6316_p8 }
  0x58   :  { %p6319_p11 = pnand %p6318_p10, %p6312_p7 }
  0x5a   :  { %6322 = shalt.err (!%p6319_p11)
}
  0x5b   :  { %60 = dma.hbm_to_vmem [thread:$0]  %s7386_s3, 128, %s58_s6, [#allocation6]  }
  0x5c   :  { %s6323_s19 = scalar_lea.hbm %s7392_s9, 512 }
  0x5d   :  { %p6324_p12 = scmp.ne.s32.totalorder %s7392_s9, %s6323_s19  ;;  %p6327_p13 = scmp.lt.u32.totalorder %s6323_s19, %s7392_s9 }
  0x5f   :  { %p6329_p0 = pnand %p6327_p13, %p6324_p12 }
  0x61   :  { %6332 = shalt.err (!%p6329_p0)
}
  0x62   :  { %s6333_s20 = scalar_lea.vmem %s6631_s0, 512  ;;  %p6338_p2 = scmp.lt.s32.totalorder %s6631_s0, %s6631_s0 }
  0x63   :  { %p6334_p1 = scmp.ne.s32.totalorder %s6631_s0, %s6333_s20  ;;  %p6339_p3 = scmp.lt.s32.totalorder %s6333_s20, %s6333_s20 }
  0x65   :  { %p6340_p4 = por %p6339_p3, %p6338_p2 }
  0x67   :  { %p6341_p5 = pnand %p6340_p4, %p6334_p1 }
  0x69   :  { %6344 = shalt.err (!%p6341_p5)
}
  0x6a   :  { %92 = dma.hbm_to_vmem [thread:$0]  %s7392_s9, 512, %s6631_s0, [#allocation9], %s6471_s2, %s6471_s2, %s6472_s22  }
  0x6b   :  { %s6477_s23 = smov [#allocation13]   ;;  %s6345_s1 = scalar_lea.hbm %s7394_s11, 512 }
  0x6c   :  { %s110_s25 = sshll.u32 %s6477_s23, 4  ;;  %p6346_p6 = scmp.ne.s32.totalorder %s7394_s11, %s6345_s1  ;;  %s111_s25 = int_to_ptr.vmem [resolvable:$true] %s110_s25 }
  0x6d   :  { %p6349_p7 = scmp.lt.u32.totalorder %s6345_s1, %s7394_s11 }
  0x6f   :  { %p6351_p8 = pnand %p6349_p7, %p6346_p6 }
  0x71   :  { %6354 = shalt.err (!%p6351_p8)
}
  0x72   :  { %s6355_s19 = scalar_lea.vmem %s111_s25, 512  ;;  %p6360_p10 = scmp.lt.s32.totalorder %s111_s25, %s111_s25 }
  0x73   :  { %p6356_p9 = scmp.ne.s32.totalorder %s111_s25, %s6355_s19  ;;  %p6361_p11 = scmp.lt.s32.totalorder %s6355_s19, %s6355_s19 }
  0x75   :  { %p6362_p12 = por %p6361_p11, %p6360_p10 }
  0x77   :  { %p6363_p13 = pnand %p6362_p12, %p6356_p9 }
  0x79   :  { %6366 = shalt.err (!%p6363_p13)
}
  0x7a   :  { %116 = dma.hbm_to_vmem [thread:$0]  %s7394_s11, 512, %s111_s25, [#allocation12], %s6471_s2, %s6471_s2, %s6472_s22  }
  0x7b   :  { %6455 = dma.done.wait [#allocation3], 16  }
  0x7c   :  { %6456 = vsyncadd [#allocation3], 4294967280 }
  0x7d   :  { %6457 = dma.done.wait [#allocation6], 144  }
  0x7e   :  { %6458 = vsyncadd [#allocation6], 4294967152 }
  0x7f   :  { %6459 = dma.done.wait [#allocation9], 2048  }
  0x80   :  { %6460 = vsyncadd [#allocation9], 4294965248 }
  0x81   :  { %6461 = dma.done.wait [#allocation12], 1024  }
  0x82   :  { %6462 = vsyncadd [#allocation12], 4294966272  ;;  %v6478_v0 = vmov 0.0|0.0   ;;  %vm6479_vm0 = vmmov 0   ;;  %v6480_v1 = vmov 0.0   ;;  %v142_v2 = vld [vmem:[%s7387_s4] sm:$0xff] }
  0x83   :  { %5819 = vmatprep.subr.bf16.mxu0 %v6478_v0  ;;  %5825 = vmatprep.subr.bf16.mxu1 %v6478_v0  ;;  %v143_v3 = vld [vmem:[%s7387_s4 + $0x8] sm:$0xff]  ;;  %v4886_v4 = vld [vmem:[%s7387_s4 + $0x20] sm:$0xff]  ;;  %v144_v7 = vld [vmem:[%s7387_s4 + $0x10] sm:$0xff]  ;;  %s7401_s24 = sld [smem:[#allocation27_spill]]  ;;  %vm153_vm1 = vcmask 261120   ;;  %vm1027_vm2 = vcmask 57344  }
  0x84   :  { %5261 = vmatprep.mubr.msk.f32.mxu1 %vm6479_vm0, %v6480_v1  ;;  %5250 = vmatprep.mubr.msk.f32.mxu0 %vm6479_vm0, %v6480_v1  ;;  %v5820_v5 = vpack.c.bf16 %v143_v3, %v142_v2  ;;  %v4887_v6 = vld [vmem:[%s7387_s4 + $0x28] sm:$0xff]  ;;  %v145_v8 = vld [vmem:[%s7387_s4 + $0x18] sm:$0xff]  ;;  %v4888_v10 = vld [vmem:[%s7387_s4 + $0x30] sm:$0xff]  ;;  %vm1039_vm3 = vcmask 64512   ;;  %vm4603_vm4 = vcmask 1040384   ;;  %vm4605_vm5 = vcmask 1041408  }
  0x85   :  { %v5826_v9 = vpack.c.bf16 %v4887_v6, %v4886_v4  ;;  %v4889_v11 = vld [vmem:[%s7387_s4 + $0x38] sm:$0xff]  ;;  %v5823_v12 = vpack.c.bf16 %v145_v8, %v144_v7  ;;  %v4893_v14 = vld [vmem:[%s7387_s4 + $0x40] sm:$0xff]  ;;  %v4894_v15 = vld [vmem:[%s7387_s4 + $0x48] sm:$0xff]  ;;  %vm4607_vm6 = vcmask 1042432   ;;  %vm4609_vm7 = vcmask 1043456   ;;  %s6481_s1 = smov [#allocation15]  }
  0x86   :  { %5821 = vmatpush3.bf16.msra.mxu0 %v5820_v5  ;;  %v5829_v13 = vpack.c.bf16 %v4889_v11, %v4888_v10  ;;  %v393_v16 = vld [vmem:[%s7388_s5] sm:$0xff]  ;;  %v394_v17 = vld [vmem:[%s7388_s5 + $0x8] sm:$0xff]  ;;  %v5832_v19 = vpack.c.bf16 %v4894_v15, %v4893_v14  ;;  %v4895_v21 = vld [vmem:[%s7387_s4 + $0x50] sm:$0xff]  ;;  %vm4611_vm8 = vcmask 1044480   ;;  %vm4820_vm9 = vcmask 259072   ;;  %s4841_s21 = sshll.u32 %s6481_s1, 4  ;;  %s4842_s21 = int_to_ptr.vmem [resolvable:$true] %s4841_s21 }
  0x87   :  { %5827 = vmatpush3.bf16.msra.mxu1 %v5826_v9  ;;  %5822 = vmatprep.subr.bf16.mxu0 %v6478_v0  ;;  %v6728_v20 = vpack.c.bf16 %v394_v17, %v393_v16  ;;  %v4896_v22 = vld [vmem:[%s7387_s4 + $0x58] sm:$0xff]  ;;  %v395_v23 = vld [vmem:[%s7388_s5 + $0x10] sm:$0xff]  ;;  %v4900_v27 = vld [vmem:[%s7388_s5 + $0x20] sm:$0xff]  ;;  %vm4823_vm10 = vcmask 62464   ;;  %vm4806_vm11 = vcmask 406528   ;;  %p6372_p1 = scmp.lt.s32.totalorder %s4842_s21, %s4842_s21 }
  0x88   :  { %5828 = vmatprep.subr.bf16.mxu1 %v6478_v0  ;;  %v396_v24 = vld [vmem:[%s7388_s5 + $0x18] sm:$0xff]  ;;  %v5835_v25 = vpack.c.bf16 %v4896_v22, %v4895_v21  ;;  %v4901_v28 = vld [vmem:[%s7388_s5 + $0x28] sm:$0xff]  ;;  %v427_v32 = vld [vmem:[#allocation5] sm:$0x1] }
  0x89   :  { %v141_v18 = vld [vmem:[%s7401_s24] sm:$0x3f]  ;;  %v6747_v26 = vpack.c.bf16 %v396_v24, %v395_v23  ;;  %v407_v29 = vld [vmem:[#allocation8] sm:$0xff]  ;;  %v408_v30 = vld [vmem:[#allocation8 + $0x8] sm:$0xff]  ;;  %v6760_v31 = vpack.c.bf16 %v4901_v28, %v4900_v27 }
  0x8a   :  { %5824 = vmatpush3.bf16.msra.mxu0 %v5823_v12  ;;  %v6764_v33 = vpack.c.bf16 %v408_v30, %v407_v29  ;;  %v4902_v34 = vld [vmem:[%s7388_s5 + $0x30] sm:$0xff]  ;;  %v4903_v35 = vld [vmem:[%s7388_s5 + $0x38] sm:$0xff]  ;;  %v410_v37 = vld [vmem:[#allocation8 + $0x18] sm:$0xff] }
  0x8b   :  { %5830 = vmatpush3.bf16.msra.mxu1 %v5829_v13  ;;  %5831 = vmatprep.subr.bf16.mxu0 %v6478_v0  ;;  %v409_v36 = vld [vmem:[#allocation8 + $0x10] sm:$0xff]  ;;  %v6776_v38 = vpack.c.bf16 %v4903_v35, %v4902_v34  ;;  %v412_v40 = vld [vmem:[#allocation8 + $0x20] sm:$0xff]  ;;  %v413_v41 = vld [vmem:[#allocation8 + $0x28] sm:$0xff] }
  0x8c   :  { %5837 = vmatprep.subr.bf16.mxu1 %v6478_v0  ;;  %v6780_v39 = vpack.c.bf16 %v410_v37, %v409_v36  ;;  %v4904_v42 = vld [vmem:[%s7388_s5 + $0x40] sm:$0xff]  ;;  %v4905_v43 = vld [vmem:[%s7388_s5 + $0x48] sm:$0xff]  ;;  %v6794_v44 = vpack.c.bf16 %v413_v41, %v412_v40  ;;  %v4906_v49 = vld [vmem:[%s7388_s5 + $0x50] sm:$0xff] }
  0x8d   :  { %5251 = vmatmul.mubr.msk.f32.vlgmr.msra.gmra.mrb[0].mxu0 %vm153_vm1, %v141_v18  ;;  %v6797_v45 = vld [vmem:[#allocation2] sm:$0x1]  ;;  %v6800_v46 = vpack.c.bf16 %v4905_v43, %v4904_v42  ;;  %v415_v48 = vld [vmem:[#allocation8 + $0x38] sm:$0xff]  ;;  %v4907_v50 = vld [vmem:[%s7388_s5 + $0x58] sm:$0xff] }
  0x8e   :  { %5262 = vmatmul.mubr.msk.f32.vlgmr.msra.gmra.mrb[0].mxu1 %vm153_vm1, %v141_v18  ;;  %5833 = vmatpush3.bf16.msra.mxu0 %v5832_v19  ;;  %v414_v47 = vld [vmem:[#allocation8 + $0x30] sm:$0xff]  ;;  %v6817_v52 = vpack.c.bf16 %v4907_v50, %v4906_v49  ;;  %v417_v53 = vld [vmem:[#allocation8 + $0x40] sm:$0xff]  ;;  %v418_v54 = vld [vmem:[#allocation8 + $0x48] sm:$0xff] }
  0x8f   :  { %5839 = vmatpush3.bf16.msra.mxu1 %v6728_v20  ;;  %5834 = vmatprep.subr.bf16.mxu0 %v6478_v0  ;;  %v6813_v51 = vpack.c.bf16 %v415_v48, %v414_v47  ;;  %v6825_v55 = vpack.c.bf16 %v418_v54, %v417_v53  ;;  %v419_v56 = vld [vmem:[#allocation8 + $0x50] sm:$0xff]  ;;  %v420_v57 = vld [vmem:[#allocation8 + $0x58] sm:$0xff]  ;;  %v422_v59 = vld [vmem:[#allocation10] sm:$0xff] }
  0x90   :  { %5840 = vmatprep.subr.bf16.mxu1 %v6478_v0  ;;  %5283 = vmatprep.mubr.msk.f32.mxu1 %vm6479_vm0, %v6480_v1  ;;  %v6834_v58 = vpack.c.bf16 %v420_v57, %v419_v56  ;;  %v423_v60 = vld [vmem:[#allocation10 + $0x8] sm:$0xff]  ;;  %v424_v62 = vld [vmem:[#allocation10 + $0x10] sm:$0xff]  ;;  %v425_v63 = vld [vmem:[#allocation10 + $0x18] sm:$0xff] }
  0x91   :  { %5272 = vmatprep.mubr.msk.f32.mxu0 %vm6479_vm0, %v6480_v1  ;;  %v6847_v61 = vpack.c.bf16 %v423_v60, %v422_v59  ;;  %v6851_v2 = vpack.c.bf16 %v425_v63, %v424_v62  ;;  %v6855_v3 = vld [vmem:[#allocation7] sm:$0xff]  ;;  %v4884_v10 = vld [vmem:[%s7390_s7] ss:$0 sm:$0xff]  ;;  %v4891_v15 = vld [vmem:[%s7390_s7 + $0x1] ss:$0 sm:$0xff] }
  0x92   :  { %5836 = vmatpush3.bf16.msra.mxu0 %v5835_v25  ;;  %v4898_v34 = vld [vmem:[%s7390_s7 + $0x2] ss:$0 sm:$0xff] }
  0x93   :  { %5842 = vmatpush3.bf16.msra.mxu1 %v6747_v26  ;;  %5849 = vmatprep.subr.bf16.mxu0 %v6478_v0 }
  0x94   :  { %5843 = vmatprep.subr.bf16.mxu1 %v6478_v0 }
  0x95   :  { %5273 = vmatmul.mubr.msk.f32.vlgmr.msra.gmra.mrb[2].mxu0 %vm153_vm1, %v141_v18 }
  0x96   :  { %5284 = vmatmul.mubr.msk.f32.vlgmr.msra.gmra.mrb[2].mxu1 %vm153_vm1, %v427_v32  ;;  %5851 = vmatpush3.bf16.msra.mxu0 %v6760_v31 }
  0x97   :  { %5845 = vmatpush3.bf16.msra.mxu1 %v6764_v33  ;;  %5852 = vmatprep.subr.bf16.mxu0 %v6478_v0 }
  0x98   :  { %5846 = vmatprep.subr.bf16.mxu1 %v6478_v0  ;;  %5294 = vmatprep.mubr.msk.f32.mxu1 %vm6479_vm0, %v6480_v1 }
  0x99   :  { %5305 = vmatprep.mubr.msk.f32.mxu0 %vm6479_vm0, %v6480_v1 }
  0x9a   :  { %5854 = vmatpush3.bf16.msra.mxu0 %v6776_v38 }
  0x9b   :  { %5848 = vmatpush3.bf16.msra.mxu1 %v6780_v39  ;;  %5855 = vmatprep.subr.bf16.mxu0 %v6478_v0 }
  0x9c   :  { %5861 = vmatprep.subr.bf16.mxu1 %v6478_v0 }
  0x9d   :  { %5306 = vmatmul.mubr.msk.f32.vlgmr.msra.gmra.mrb[4].mxu0 %vm153_vm1, %v427_v32 }
  0x9e   :  { %5295 = vmatmul.mubr.msk.f32.vlgmr.msra.gmra.mrb[2].mxu1 %vm153_vm1, %v6797_v45  ;;  %5857 = vmatpush3.bf16.msra.mxu0 %v6794_v44 }
  0x9f   :  { %5863 = vmatpush3.bf16.msra.mxu1 %v6800_v46  ;;  %5858 = vmatprep.subr.bf16.mxu0 %v6478_v0 }
  0xa0   :  { %5864 = vmatprep.subr.bf16.mxu1 %v6478_v0  ;;  %5316 = vmatprep.mubr.msk.f32.mxu0 %vm6479_vm0, %v6480_v1 }
  0xa1   :  { %5327 = vmatprep.mubr.msk.f32.mxu1 %vm6479_vm0, %v6480_v1 }
  0xa2   :  { %5860 = vmatpush3.bf16.msra.mxu0 %v6813_v51 }
  0xa3   :  { %5866 = vmatpush3.bf16.msra.mxu1 %v6817_v52  ;;  %5867 = vmatprep.subr.bf16.mxu0 %v6478_v0 }
  0xa4   :  { %5873 = vmatprep.subr.bf16.mxu1 %v6478_v0 }
  0xa5   :  { %5317 = vmatmul.mubr.msk.f32.vlgmr.msra.gmra.mrb[4].mxu0 %vm153_vm1, %v6797_v45 }
  0xa6   :  { %5328 = vmatmul.mubr.msk.f32.vlgmr.msra.gmra.mrb[4].mxu1 %vm153_vm1, %v427_v32  ;;  %5869 = vmatpush3.bf16.msra.mxu0 %v6825_v55  ;;  %v6875_v32 = vld [vmem:[%s7391_s8] sm:$0x1] }
  0xa7   :  { %5870 = vmatprep.subr.bf16.mxu0 %v6478_v0  ;;  %5338 = vmatprep.mubr.msk.f32.mxu0 %vm6479_vm0, %v6480_v1 }
  0xa8   :  { %5349 = vmatprep.mubr.msk.f32.mxu1 %vm6479_vm0, %v6480_v1  ;;  %5875 = vmatpush3.bf16.msra.mxu1 %v6847_v61 }
  0xa9   :  { %5876 = vmatprep.subr.bf16.mxu1 %v6478_v0 }
  0xaa   :  { %5872 = vmatpush3.bf16.msra.mxu0 %v6834_v58 }
  0xab   :  { %5352 = vmatprep.subr.mxu0 %v6480_v1 }
  0xac   :  { %5878 = vmatpush3.bf16.msra.mxu1 %v6851_v2 }
  0xad   :  { %5339 = vmatmul.mubr.msk.f32.vlgmr.msra.gmra.mrb[6].mxu0 %vm153_vm1, %v6797_v45  ;;  %5357 = vmatprep.subr.mxu1 %v6480_v1 }
  0xae   :  { %5354 = vmatprep.mubr.msk.f32.mxu0 %vm6479_vm0, %v6480_v1 }
  0xb3   :  { %5353 = vmatpush3.xpose.msk.msra.mxu0 %vm153_vm1, %v6855_v3 }
  0xb4   :  { %5879 = vmatprep.subr.bf16.mxu0 %v6478_v0 }
 0x160   :  { %v223_v4 = vpop.f32.mrb[0].mxu0 }
 0x161   :  { %v306_v5 = vpop.f32.mrb[0].mxu1  ;;  %v5252_v6 = vpop.f32.mrb[1].mxu0  ;;  %v6863_v11 = vadd.f32 %v4884_v10, %v223_v4 }
 0x162   :  { %v5263_v7 = vpop.f32.mrb[1].mxu1  ;;  %v6869_v17 = vadd.f32 %v4891_v15, %v306_v5 }
 0x168   :  { %v389_v8 = vpop.f32.mrb[2].mxu0 }
 0x169   :  { %v5274_v9 = vpop.f32.mrb[3].mxu0  ;;  %v6881_v37 = vadd.f32 %v4898_v34, %v389_v8 }
 0x171   :  { %v571_v12 = vpop.f32.mrb[2].mxu1 }
 0x172   :  { %v6101_v13 = vadd.f32 %v571_v12, %v6863_v11  ;;  %v5296_v14 = vpop.f32.mrb[3].mxu1 }
 0x174   :  { %v4910_v16 = vmul.f32 -1.442695, %v6101_v13 }
 0x176   :  { %6123 = vpow2.f32 %v4910_v16 }
 0x178   :  { %v719_v18 = vpop.f32.mrb[4].mxu0 }
 0x179   :  { %v6102_v19 = vadd.f32 %v719_v18, %v6869_v17  ;;  %v796_v21 = vpop.f32.mrb[4].mxu1  ;;  %v5318_v22 = vpop.f32.mrb[5].mxu0 }
 0x17a   :  { %v5329_v23 = vpop.f32.mrb[5].mxu1  ;;  %v800_v41 = vadd.f32 %v796_v21, %v6881_v37 }
 0x17b   :  { %v4913_v24 = vmul.f32 -1.442695, %v6102_v19 }
 0x17d   :  { %6125 = vpow2.f32 %v4913_v24 }
 0x180   :  { %v6124_v25 = vpop.eup %6123  ;;  %v867_v27 = vpop.f32.mrb[6].mxu0 }
 0x181   :  { %v579_v28 = vadd.f32 1.0, %v6124_v25  ;;  %v5340_v29 = vpop.f32.mrb[7].mxu0  ;;  %v868_v36 = vadd.f32 %v867_v27, %v6875_v32 }
 0x183   :  { %6127 = vrcp.f32 %v579_v28 }
 0x187   :  { %v6126_v30 = vpop.eup %6125 }
 0x188   :  { %v727_v35 = vadd.f32 1.0, %v6126_v30 }
 0x18a   :  { %6129 = vrcp.f32 %v727_v35 }
 0x18d   :  { %v6128_v40 = vpop.eup %6127 }
 0x18e   :  { %v871_v42 = vmul.f32 %v6128_v40, %v868_v36 }
 0x190   :  { %v872_v43 = vadd.f32 %v871_v42, %v800_v41 }
 0x192   :  { %6131 = vtanh.f32 %v872_v43 }
 0x194   :  { %v6130_v47 = vpop.eup %6129 }
 0x195   :  { %v874_v48 = vsub.f32 1.0, %v6130_v47  ;;  %v876_v50 = vmul.f32 %v6130_v47, %v6797_v45 }
 0x19c   :  { %v6132_v49 = vpop.eup %6131 }
 0x19d   :  { %v875_v53 = vmul.f32 %v6132_v49, %v874_v48 }
 0x19f   :  { %v6885_v54 = vadd.f32 %v876_v50, %v875_v53 }
 0x1a1   :  { %5350 = vmatmul.mubr.msk.f32.vlgmr.msra.gmra.mrb[6].mxu1 %vm153_vm1, %v6885_v54 }
 0x1a2   :  { %5358 = vmatpush3.msra.mxu1 %v6855_v3  ;;  %5359 = vmatprep.mubr.msk.f32.mxu1 %vm6479_vm0, %v6480_v1 }
 0x1a3   :  { %5885 = vmatprep.subr.bf16.mxu1 %v6478_v0 }
 0x274   :  { %v947_v56 = vpop.f32.mrb[6].mxu1 }
 0x275   :  { %v5351_v57 = vpop.f32.mrb[7].mxu1  ;;  %5355 = vmatmul.mubr.msk.f32.vlgmr.msra.gmra.mrb[8].mxu0 %vm153_vm1, %v947_v56 }
 0x276   :  { %5881 = vmatpush3.bf16.msra.mxu0 %v6728_v20  ;;  %5370 = vmatprep.mubr.msk.f32.mxu0 %vm6479_vm0, %v6480_v1 }
 0x277   :  { %5882 = vmatprep.subr.bf16.mxu0 %v6478_v0 }
 0x27a   :  { %5884 = vmatpush3.bf16.msra.mxu0 %v6747_v26 }
 0x27b   :  { %5891 = vmatprep.subr.bf16.mxu0 %v6478_v0 }
 0x348   :  { %v1023_v45 = vpop.f32.mrb[8].mxu0 }
 0x349   :  { %v5356_v59 = vpop.f32.mrb[9].mxu0  ;;  %v1028_v60 = vsel %vm1027_vm2, %v1023_v45, -inf }
 0x34a   :  { %1029 = vmax.xlane.f32.xlu0 %v1028_v60 }
 0x3d7   :  { %v1030_v62 = vpop.xlane.xlu0 %1029 }
 0x3d8   :  { %v1031_v63 = vsub.f32 %v1023_v45, %v1030_v62 }
 0x3da   :  { %v1032_v4 = vmul.f32 1.442695, %v1031_v63 }
 0x3dc   :  { %6133 = vpow2.f32 %v1032_v4 }
 0x3e6   :  { %v6134_v5 = vpop.eup %6133 }
 0x3e7   :  { %v1034_v6 = vsel %vm1027_vm2, %v6134_v5, 0.0 }
 0x3e8   :  { %1035 = vadd.xlane.f32.xlu0 %v1034_v6 }
 0x475   :  { %v1036_v7 = vpop.xlane.xlu0 %1035 }
 0x476   :  { %6135 = vrcp.f32 %v1036_v7 }
 0x480   :  { %v6136_v8 = vpop.eup %6135 }
 0x481   :  { %v6902_v9 = vmul.f32 %v6136_v8, %v6134_v5  ;;  %v1576_v5 = vrot.slane %v6885_v54, 7 }
 0x483   :  { %5360 = vmatmul.mubr.msk.f32.vlgmr.msra.gmra.mrb[8].mxu1 %vm1039_vm3, %v6902_v9 }
 0x484   :  { %5887 = vmatpush3.bf16.msra.mxu1 %v6764_v33  ;;  %5381 = vmatprep.mubr.msk.f32.mxu1 %vm6479_vm0, %v6480_v1 }
 0x485   :  { %5888 = vmatprep.subr.bf16.mxu1 %v6478_v0 }
 0x488   :  { %5890 = vmatpush3.bf16.msra.mxu1 %v6780_v39 }
 0x489   :  { %5897 = vmatprep.subr.bf16.mxu1 %v6478_v0 }
 0x48b   :  { %5382 = vmatmul.mubr.msk.f32.vlgmr.msra.gmra.mrb[10].mxu1 %vm153_vm1, %v6885_v54 }
 0x48c   :  { %5899 = vmatpush3.bf16.msra.mxu1 %v6794_v44  ;;  %5403 = vmatprep.mubr.msk.f32.mxu1 %vm6479_vm0, %v6480_v1 }
 0x48d   :  { %5900 = vmatprep.subr.bf16.mxu1 %v6478_v0 }
 0x490   :  { %5902 = vmatpush3.bf16.msra.mxu1 %v6813_v51 }
 0x491   :  { %5909 = vmatprep.subr.bf16.mxu1 %v6478_v0 }
 0x493   :  { %5404 = vmatmul.mubr.msk.f32.vlgmr.msra.gmra.mrb[12].mxu1 %vm153_vm1, %v6885_v54 }
 0x494   :  { %5911 = vmatpush3.bf16.msra.mxu1 %v6825_v55  ;;  %5425 = vmatprep.mubr.msk.f32.mxu1 %vm6479_vm0, %v6480_v1 }
 0x495   :  { %5912 = vmatprep.subr.bf16.mxu1 %v6478_v0 }
 0x498   :  { %5914 = vmatpush3.bf16.msra.mxu1 %v6834_v58 }
 0x499   :  { %5439 = vmatprep.subr.mxu1 %v6480_v1 }
 0x49b   :  { %5426 = vmatmul.mubr.msk.f32.vlgmr.msra.gmra.mrb[14].mxu1 %vm153_vm1, %v6885_v54 }
 0x49c   :  { %5441 = vmatprep.mubr.msk.f32.mxu1 %vm6479_vm0, %v6480_v1 }
 0x4a1   :  { %5440 = vmatpush3.xpose.msk.msra.mxu1 %vm153_vm1, %v6855_v3 }
 0x4a2   :  { %5444 = vmatprep.subr.mxu1 %v6480_v1 }
 0x556   :  { %v6935_v10 = vpop.f32.mrb[8].mxu1 }
 0x557   :  { %v5361_v12 = vpop.f32.mrb[9].mxu1  ;;  %5371 = vmatmul.mubr.msk.f32.vlgmr.msra.gmra.mrb[10].mxu0 %vm153_vm1, %v6935_v10 }
 0x558   :  { %5893 = vmatpush3.bf16.msra.mxu0 %v6760_v31  ;;  %5392 = vmatprep.mubr.msk.f32.mxu0 %vm6479_vm0, %v6480_v1 }
 0x559   :  { %5894 = vmatprep.subr.bf16.mxu0 %v6478_v0 }
 0x55c   :  { %5896 = vmatpush3.bf16.msra.mxu0 %v6776_v38 }
 0x55d   :  { %5903 = vmatprep.subr.bf16.mxu0 %v6478_v0 }
 0x55e   :  { %v1256_v13 = vpop.f32.mrb[10].mxu1 }
 0x55f   :  { %v5383_v14 = vpop.f32.mrb[11].mxu1  ;;  %5393 = vmatmul.mubr.msk.f32.vlgmr.msra.gmra.mrb[12].mxu0 %vm153_vm1, %v6935_v10  ;;  %v1261_v24 = vrot.slane %v1256_v13, 7 }
 0x560   :  { %5905 = vmatpush3.bf16.msra.mxu0 %v6800_v46  ;;  %5414 = vmatprep.mubr.msk.f32.mxu0 %vm6479_vm0, %v6480_v1 }
 0x561   :  { %5906 = vmatprep.subr.bf16.mxu0 %v6478_v0 }
 0x564   :  { %5908 = vmatpush3.bf16.msra.mxu0 %v6817_v52 }
 0x565   :  { %5915 = vmatprep.subr.bf16.mxu0 %v6478_v0 }
 0x566   :  { %v1410_v15 = vpop.f32.mrb[12].mxu1 }
 0x567   :  { %v5405_v16 = vpop.f32.mrb[13].mxu1  ;;  %5415 = vmatmul.mubr.msk.f32.vlgmr.msra.gmra.mrb[14].mxu0 %vm153_vm1, %v6935_v10  ;;  %v1415_v35 = vrot.slane %v1410_v15, 7 }
 0x568   :  { %5917 = vmatpush3.bf16.msra.mxu0 %v6847_v61  ;;  %5436 = vmatprep.mubr.msk.f32.mxu0 %vm6479_vm0, %v6480_v1 }
 0x569   :  { %5918 = vmatprep.subr.bf16.mxu0 %v6478_v0 }
 0x56c   :  { %5920 = vmatpush3.bf16.msra.mxu0 %v6851_v2 }
 0x56d   :  { %5921 = vmatprep.subr.bf16.mxu0 %v6478_v0 }
 0x56e   :  { %v1564_v18 = vpop.f32.mrb[14].mxu1 }
 0x56f   :  { %v5427_v19 = vpop.f32.mrb[15].mxu1  ;;  %v1565_v50 = vadd.f32 %v1564_v18, %v6875_v32 }
 0x571   :  { %v1569_v57 = vrot.slane %v1565_v50, 7 }
 0x62a   :  { %v1182_v21 = vpop.f32.mrb[10].mxu0 }
 0x62b   :  { %v1187_v22 = vrot.slane %v1182_v21, 7  ;;  %v5372_v23 = vpop.f32.mrb[11].mxu0 }
 0x62d   :  { %v1189_v25 = vadd.f32 %v1187_v22, %v6863_v11 }
 0x62f   :  { %v1263_v27 = vadd.f32 %v1261_v24, %v1189_v25 }
 0x631   :  { %v4922_v28 = vmul.f32 -1.442695, %v1263_v27 }
 0x632   :  { %v1336_v29 = vpop.f32.mrb[12].mxu0 }
 0x633   :  { %6137 = vpow2.f32 %v4922_v28  ;;  %v1341_v30 = vrot.slane %v1336_v29, 7  ;;  %v5394_v34 = vpop.f32.mrb[13].mxu0 }
 0x635   :  { %v1343_v36 = vadd.f32 %v1341_v30, %v6869_v17 }
 0x637   :  { %v1417_v40 = vadd.f32 %v1415_v35, %v1343_v36 }
 0x639   :  { %v4925_v41 = vmul.f32 -1.442695, %v1417_v40 }
 0x63a   :  { %v1490_v42 = vpop.f32.mrb[14].mxu0 }
 0x63b   :  { %6139 = vpow2.f32 %v4925_v41  ;;  %v5416_v43 = vpop.f32.mrb[15].mxu0  ;;  %v1495_v56 = vrot.slane %v1490_v42, 7 }
 0x63d   :  { %v6138_v47 = vpop.eup %6137  ;;  %v1497_v59 = vadd.f32 %v1495_v56, %v6881_v37 }
 0x63e   :  { %v1267_v48 = vadd.f32 1.0, %v6138_v47 }
 0x640   :  { %6141 = vrcp.f32 %v1267_v48 }
 0x645   :  { %v6140_v49 = vpop.eup %6139 }
 0x646   :  { %v1421_v53 = vadd.f32 1.0, %v6140_v49 }
 0x648   :  { %6143 = vrcp.f32 %v1421_v53 }
 0x64a   :  { %v6142_v45 = vpop.eup %6141 }
 0x64b   :  { %v1571_v60 = vmul.f32 %v6142_v45, %v1569_v57 }
 0x64d   :  { %v1572_v62 = vadd.f32 %v1571_v60, %v1497_v59 }
 0x64f   :  { %6145 = vtanh.f32 %v1572_v62 }
 0x652   :  { %v6144_v63 = vpop.eup %6143 }
 0x653   :  { %v1574_v4 = vsub.f32 1.0, %v6144_v63  ;;  %v1578_v8 = vmul.f32 %v6144_v63, %v1576_v5 }
 0x659   :  { %v6146_v6 = vpop.eup %6145 }
 0x65a   :  { %v1575_v7 = vmul.f32 %v6146_v6, %v1574_v4 }
 0x65c   :  { %v6966_v12 = vadd.f32 %v1578_v8, %v1575_v7 }
 0x65e   :  { %v1581_v13 = vrot.slane %v6966_v12, 1 }
 0x660   :  { %5437 = vmatmul.mubr.msk.f32.vlgmr.msra.gmra.mrb[16].mxu0 %vm153_vm1, %v1581_v13 }
 0x661   :  { %5923 = vmatpush3.bf16.msra.mxu0 %v6728_v20  ;;  %5457 = vmatprep.mubr.msk.f32.mxu0 %vm6479_vm0, %v6480_v1 }
 0x662   :  { %5924 = vmatprep.subr.bf16.mxu0 %v6478_v0 }
 0x665   :  { %5926 = vmatpush3.bf16.msra.mxu0 %v6747_v26 }
 0x666   :  { %5933 = vmatprep.subr.bf16.mxu0 %v6478_v0 }
 0x733   :  { %v1650_v14 = vpop.f32.mrb[16].mxu0 }
 0x734   :  { %v5438_v15 = vpop.f32.mrb[17].mxu0  ;;  %5442 = vmatmul.mubr.msk.f32.vlgmr.msra.gmra.mrb[16].mxu1 %vm153_vm1, %v1650_v14 }
 0x735   :  { %5445 = vmatpush3.msra.mxu1 %v6855_v3  ;;  %5446 = vmatprep.mubr.msk.f32.mxu1 %vm6479_vm0, %v6480_v1 }
 0x736   :  { %5927 = vmatprep.subr.bf16.mxu1 %v6478_v0 }
 0x807   :  { %v1723_v16 = vpop.f32.mrb[16].mxu1 }
 0x808   :  { %v5443_v18 = vpop.f32.mrb[17].mxu1  ;;  %v1727_v19 = vsel %vm1027_vm2, %v1723_v16, -inf }
 0x809   :  { %1728 = vmax.xlane.f32.xlu1 %v1727_v19 }
 0x896   :  { %v1729_v21 = vpop.xlane.xlu1 %1728 }
 0x897   :  { %v1730_v22 = vsub.f32 %v1723_v16, %v1729_v21 }
 0x899   :  { %v1731_v23 = vmul.f32 1.442695, %v1730_v22 }
 0x89b   :  { %6147 = vpow2.f32 %v1731_v23 }
 0x8a5   :  { %v6148_v24 = vpop.eup %6147 }
 0x8a6   :  { %v1733_v25 = vsel %vm1027_vm2, %v6148_v24, 0.0 }
 0x8a7   :  { %1734 = vadd.xlane.f32.xlu1 %v1733_v25 }
 0x934   :  { %v1735_v27 = vpop.xlane.xlu1 %1734 }
 0x935   :  { %6149 = vrcp.f32 %v1735_v27  ;;  %v2274_v27 = vrot.slane %v6966_v12, 7 }
 0x93f   :  { %v6150_v28 = vpop.eup %6149 }
 0x940   :  { %v6983_v29 = vmul.f32 %v6150_v28, %v6148_v24 }
 0x942   :  { %5447 = vmatmul.mubr.msk.f32.vlgmr.msra.gmra.mrb[18].mxu1 %vm1039_vm3, %v6983_v29 }
 0x943   :  { %5929 = vmatpush3.bf16.msra.mxu1 %v6764_v33  ;;  %5468 = vmatprep.mubr.msk.f32.mxu1 %vm6479_vm0, %v6480_v1 }
 0x944   :  { %5930 = vmatprep.subr.bf16.mxu1 %v6478_v0 }
 0x947   :  { %5932 = vmatpush3.bf16.msra.mxu1 %v6780_v39 }
 0x948   :  { %5939 = vmatprep.subr.bf16.mxu1 %v6478_v0 }
 0x94a   :  { %5469 = vmatmul.mubr.msk.f32.vlgmr.msra.gmra.mrb[20].mxu1 %vm153_vm1, %v1581_v13 }
 0x94b   :  { %5941 = vmatpush3.bf16.msra.mxu1 %v6794_v44  ;;  %5490 = vmatprep.mubr.msk.f32.mxu1 %vm6479_vm0, %v6480_v1 }
 0x94c   :  { %5942 = vmatprep.subr.bf16.mxu1 %v6478_v0 }
 0x94f   :  { %5944 = vmatpush3.bf16.msra.mxu1 %v6813_v51 }
 0x950   :  { %5951 = vmatprep.subr.bf16.mxu1 %v6478_v0 }
 0x952   :  { %5491 = vmatmul.mubr.msk.f32.vlgmr.msra.gmra.mrb[22].mxu1 %vm153_vm1, %v1581_v13 }
 0x953   :  { %5953 = vmatpush3.bf16.msra.mxu1 %v6825_v55  ;;  %5512 = vmatprep.mubr.msk.f32.mxu1 %vm6479_vm0, %v6480_v1 }
 0x954   :  { %5954 = vmatprep.subr.bf16.mxu1 %v6478_v0 }
 0x957   :  { %5956 = vmatpush3.bf16.msra.mxu1 %v6834_v58 }
 0x958   :  { %5526 = vmatprep.subr.mxu1 %v6480_v1 }
 0x95a   :  { %5513 = vmatmul.mubr.msk.f32.vlgmr.msra.gmra.mrb[24].mxu1 %vm153_vm1, %v1581_v13 }
 0x95b   :  { %5528 = vmatprep.mubr.msk.f32.mxu1 %vm6479_vm0, %v6480_v1 }
 0x960   :  { %5527 = vmatpush3.xpose.msk.msra.mxu1 %vm153_vm1, %v6855_v3 }
 0x961   :  { %5531 = vmatprep.subr.mxu1 %v6480_v1 }
 0xa15   :  { %v1807_v30 = vpop.f32.mrb[18].mxu1 }
 0xa16   :  { %v4613_v34 = vrot.slane %v1807_v30, 7  ;;  %v5448_v35 = vpop.f32.mrb[19].mxu1  ;;  %5458 = vmatmul.mubr.msk.f32.vlgmr.msra.gmra.mrb[18].mxu0 %vm153_vm1, %v1807_v30 }
 0xa17   :  { %5935 = vmatpush3.bf16.msra.mxu0 %v6760_v31  ;;  %5479 = vmatprep.mubr.msk.f32.mxu0 %vm6479_vm0, %v6480_v1 }
 0xa18   :  { %v7019_v36 = vsel %vm4603_vm4, %v6935_v10, %v4613_v34  ;;  %5936 = vmatprep.subr.bf16.mxu0 %v6478_v0 }
 0xa1b   :  { %5938 = vmatpush3.bf16.msra.mxu0 %v6776_v38 }
 0xa1c   :  { %5945 = vmatprep.subr.bf16.mxu0 %v6478_v0 }
 0xa1d   :  { %v1954_v40 = vpop.f32.mrb[20].mxu1 }
 0xa1e   :  { %v5470_v41 = vpop.f32.mrb[21].mxu1  ;;  %5480 = vmatmul.mubr.msk.f32.vlgmr.msra.gmra.mrb[20].mxu0 %vm153_vm1, %v1807_v30  ;;  %v1959_v53 = vrot.slane %v1954_v40, 6 }
 0xa1f   :  { %5947 = vmatpush3.bf16.msra.mxu0 %v6800_v46  ;;  %5501 = vmatprep.mubr.msk.f32.mxu0 %vm6479_vm0, %v6480_v1 }
 0xa20   :  { %5948 = vmatprep.subr.bf16.mxu0 %v6478_v0 }
 0xa23   :  { %5950 = vmatpush3.bf16.msra.mxu0 %v6817_v52 }
 0xa24   :  { %5957 = vmatprep.subr.bf16.mxu0 %v6478_v0 }
 0xa25   :  { %v2108_v10 = vpop.f32.mrb[22].mxu1 }
 0xa26   :  { %v5492_v42 = vpop.f32.mrb[23].mxu1  ;;  %5502 = vmatmul.mubr.msk.f32.vlgmr.msra.gmra.mrb[22].mxu0 %vm153_vm1, %v1807_v30  ;;  %v2113_v63 = vrot.slane %v2108_v10, 6  ;;  %v4604_v10 = vsel %vm4603_vm4, %v6885_v54, %v6966_v12 }
 0xa27   :  { %5959 = vmatpush3.bf16.msra.mxu0 %v6847_v61  ;;  %5523 = vmatprep.mubr.msk.f32.mxu0 %vm6479_vm0, %v6480_v1 }
 0xa28   :  { %5960 = vmatprep.subr.bf16.mxu0 %v6478_v0 }
 0xa2b   :  { %5962 = vmatpush3.bf16.msra.mxu0 %v6851_v2 }
 0xa2c   :  { %5963 = vmatprep.subr.bf16.mxu0 %v6478_v0 }
 0xa2d   :  { %v2262_v43 = vpop.f32.mrb[24].mxu1 }
 0xa2e   :  { %v5514_v47 = vpop.f32.mrb[25].mxu1  ;;  %v2263_v16 = vadd.f32 %v2262_v43, %v6875_v32 }
 0xa30   :  { %v2267_v21 = vrot.slane %v2263_v16, 6 }
 0xae9   :  { %v1880_v48 = vpop.f32.mrb[18].mxu0 }
 0xaea   :  { %v1885_v49 = vrot.slane %v1880_v48, 6  ;;  %v5459_v50 = vpop.f32.mrb[19].mxu0 }
 0xaec   :  { %v1887_v56 = vadd.f32 %v1885_v49, %v6863_v11 }
 0xaee   :  { %v1961_v57 = vadd.f32 %v1959_v53, %v1887_v56 }
 0xaf0   :  { %v4934_v45 = vmul.f32 -1.442695, %v1961_v57 }
 0xaf1   :  { %v2034_v59 = vpop.f32.mrb[20].mxu0 }
 0xaf2   :  { %6151 = vpow2.f32 %v4934_v45  ;;  %v2039_v60 = vrot.slane %v2034_v59, 6  ;;  %v5481_v62 = vpop.f32.mrb[21].mxu0 }
 0xaf3   :  { %v4629_v62 = vrot.slane %v6983_v29, 7 }
 0xaf4   :  { %v2041_v4 = vadd.f32 %v2039_v60, %v6869_v17 }
 0xaf6   :  { %v2115_v5 = vadd.f32 %v2113_v63, %v2041_v4 }
 0xaf8   :  { %v4937_v6 = vmul.f32 -1.442695, %v2115_v5  ;;  %v4639_v5 = vsel %vm4603_vm4, %v6902_v9, %v4629_v62 }
 0xaf9   :  { %v2188_v7 = vpop.f32.mrb[22].mxu0 }
 0xafa   :  { %6153 = vpow2.f32 %v4937_v6  ;;  %v5503_v8 = vpop.f32.mrb[23].mxu0  ;;  %v2193_v19 = vrot.slane %v2188_v7, 6 }
 0xafc   :  { %v6152_v13 = vpop.eup %6151  ;;  %v2195_v23 = vadd.f32 %v2193_v19, %v6881_v37 }
 0xafd   :  { %v1965_v14 = vadd.f32 1.0, %v6152_v13 }
 0xaff   :  { %6155 = vrcp.f32 %v1965_v14 }
 0xb04   :  { %v6154_v15 = vpop.eup %6153 }
 0xb05   :  { %v2119_v18 = vadd.f32 1.0, %v6154_v15 }
 0xb07   :  { %6157 = vrcp.f32 %v2119_v18 }
 0xb09   :  { %v6156_v22 = vpop.eup %6155 }
 0xb0a   :  { %v2269_v24 = vmul.f32 %v6156_v22, %v2267_v21 }
 0xb0c   :  { %v2270_v25 = vadd.f32 %v2269_v24, %v2195_v23 }
 0xb0e   :  { %6159 = vtanh.f32 %v2270_v25 }
 0xb11   :  { %v6158_v28 = vpop.eup %6157 }
 0xb12   :  { %v2276_v30 = vmul.f32 %v6158_v28, %v2274_v27  ;;  %v2272_v34 = vsub.f32 1.0, %v6158_v28 }
 0xb18   :  { %v6160_v35 = vpop.eup %6159 }
 0xb19   :  { %v2273_v40 = vmul.f32 %v6160_v35, %v2272_v34 }
 0xb1b   :  { %v7043_v41 = vadd.f32 %v2276_v30, %v2273_v40 }
 0xb1d   :  { %v2279_v42 = vrot.slane %v7043_v41, 2  ;;  %v7051_v43 = vsel %vm4605_vm5, %v4604_v10, %v7043_v41 }
 0xb1f   :  { %5524 = vmatmul.mubr.msk.f32.vlgmr.msra.gmra.mrb[24].mxu0 %vm153_vm1, %v2279_v42 }
 0xb20   :  { %5965 = vmatpush3.bf16.msra.mxu0 %v6728_v20  ;;  %5544 = vmatprep.mubr.msk.f32.mxu0 %vm6479_vm0, %v6480_v1 }
 0xb21   :  { %5966 = vmatprep.subr.bf16.mxu0 %v6478_v0 }
 0xb24   :  { %5968 = vmatpush3.bf16.msra.mxu0 %v6747_v26 }
 0xb25   :  { %5975 = vmatprep.subr.bf16.mxu0 %v6478_v0 }
 0xbf2   :  { %v2348_v54 = vpop.f32.mrb[24].mxu0 }
 0xbf3   :  { %v5525_v12 = vpop.f32.mrb[25].mxu0  ;;  %5529 = vmatmul.mubr.msk.f32.vlgmr.msra.gmra.mrb[26].mxu1 %vm153_vm1, %v2348_v54 }
 0xbf4   :  { %5532 = vmatpush3.msra.mxu1 %v6855_v3  ;;  %5533 = vmatprep.mubr.msk.f32.mxu1 %vm6479_vm0, %v6480_v1 }
 0xbf5   :  { %5969 = vmatprep.subr.bf16.mxu1 %v6478_v0 }
 0xcc6   :  { %v2421_v47 = vpop.f32.mrb[26].mxu1 }
 0xcc7   :  { %v5530_v48 = vpop.f32.mrb[27].mxu1  ;;  %v2425_v49 = vsel %vm1027_vm2, %v2421_v47, -inf }
 0xcc8   :  { %2426 = vmax.xlane.f32.xlu0 %v2425_v49 }
 0xd55   :  { %v2427_v50 = vpop.xlane.xlu0 %2426 }
 0xd56   :  { %v2428_v53 = vsub.f32 %v2421_v47, %v2427_v50 }
 0xd58   :  { %v2429_v56 = vmul.f32 1.442695, %v2428_v53 }
 0xd5a   :  { %6161 = vpow2.f32 %v2429_v56 }
 0xd64   :  { %v6162_v57 = vpop.eup %6161 }
 0xd65   :  { %v2431_v45 = vsel %vm1027_vm2, %v6162_v57, 0.0 }
 0xd66   :  { %2432 = vadd.xlane.f32.xlu1 %v2431_v45 }
 0xdf3   :  { %v2433_v59 = vpop.xlane.xlu1 %2432 }
 0xdf4   :  { %6163 = vrcp.f32 %v2433_v59 }
 0xdfe   :  { %v6164_v60 = vpop.eup %6163 }
 0xdff   :  { %v2435_v63 = vmul.f32 %v6164_v60, %v6162_v57 }
 0xe01   :  { %v4631_v4 = vrot.slane %v2435_v63, 6  ;;  %5534 = vmatmul.mubr.msk.f32.vlgmr.msra.gmra.mrb[28].mxu1 %vm1039_vm3, %v2435_v63  ;;  %v2972_v63 = vrot.slane %v7043_v41, 7 }
 0xe02   :  { %5971 = vmatpush3.bf16.msra.mxu1 %v6764_v33  ;;  %5555 = vmatprep.mubr.msk.f32.mxu1 %vm6479_vm0, %v6480_v1 }
 0xe03   :  { %5972 = vmatprep.subr.bf16.mxu1 %v6478_v0  ;;  %v7076_v6 = vsel %vm4605_vm5, %v4639_v5, %v4631_v4 }
 0xe06   :  { %5974 = vmatpush3.bf16.msra.mxu1 %v6780_v39 }
 0xe07   :  { %5981 = vmatprep.subr.bf16.mxu1 %v6478_v0 }
 0xe09   :  { %5556 = vmatmul.mubr.msk.f32.vlgmr.msra.gmra.mrb[30].mxu1 %vm153_vm1, %v2279_v42 }
 0xe0a   :  { %5983 = vmatpush3.bf16.msra.mxu1 %v6794_v44  ;;  %5577 = vmatprep.mubr.msk.f32.mxu1 %vm6479_vm0, %v6480_v1 }
 0xe0b   :  { %5984 = vmatprep.subr.bf16.mxu1 %v6478_v0 }
 0xe0e   :  { %5986 = vmatpush3.bf16.msra.mxu1 %v6813_v51 }
 0xe0f   :  { %5993 = vmatprep.subr.bf16.mxu1 %v6478_v0 }
 0xe11   :  { %5578 = vmatmul.mubr.msk.f32.vlgmr.msra.gmra.mrb[32].mxu1 %vm153_vm1, %v2279_v42 }
 0xe12   :  { %5995 = vmatpush3.bf16.msra.mxu1 %v6825_v55  ;;  %5599 = vmatprep.mubr.msk.f32.mxu1 %vm6479_vm0, %v6480_v1 }
 0xe13   :  { %5996 = vmatprep.subr.bf16.mxu1 %v6478_v0 }
 0xe16   :  { %5998 = vmatpush3.bf16.msra.mxu1 %v6834_v58 }
 0xe17   :  { %5613 = vmatprep.subr.mxu1 %v6480_v1 }
 0xe19   :  { %5600 = vmatmul.mubr.msk.f32.vlgmr.msra.gmra.mrb[34].mxu1 %vm153_vm1, %v2279_v42 }
 0xe1a   :  { %5615 = vmatprep.mubr.msk.f32.mxu1 %vm6479_vm0, %v6480_v1 }
 0xe1f   :  { %5614 = vmatpush3.xpose.msk.msra.mxu1 %vm153_vm1, %v6855_v3 }
 0xe20   :  { %5618 = vmatprep.subr.mxu1 %v6480_v1 }
 0xed4   :  { %v2505_v9 = vpop.f32.mrb[28].mxu1 }
 0xed5   :  { %v4615_v29 = vrot.slane %v2505_v9, 6  ;;  %v5535_v7 = vpop.f32.mrb[29].mxu1  ;;  %5545 = vmatmul.mubr.msk.f32.vlgmr.msra.gmra.mrb[26].mxu0 %vm153_vm1, %v2505_v9 }
 0xed6   :  { %5977 = vmatpush3.bf16.msra.mxu0 %v6760_v31  ;;  %5566 = vmatprep.mubr.msk.f32.mxu0 %vm6479_vm0, %v6480_v1 }
 0xed7   :  { %v7106_v8 = vsel %vm4605_vm5, %v7019_v36, %v4615_v29  ;;  %5978 = vmatprep.subr.bf16.mxu0 %v6478_v0 }
 0xeda   :  { %5980 = vmatpush3.bf16.msra.mxu0 %v6776_v38 }
 0xedb   :  { %5987 = vmatprep.subr.bf16.mxu0 %v6478_v0 }
 0xedc   :  { %v2652_v13 = vpop.f32.mrb[30].mxu1 }
 0xedd   :  { %v5557_v14 = vpop.f32.mrb[31].mxu1  ;;  %5567 = vmatmul.mubr.msk.f32.vlgmr.msra.gmra.mrb[28].mxu0 %vm153_vm1, %v2505_v9  ;;  %v2657_v23 = vrot.slane %v2652_v13, 5 }
 0xede   :  { %5989 = vmatpush3.bf16.msra.mxu0 %v6800_v46  ;;  %5588 = vmatprep.mubr.msk.f32.mxu0 %vm6479_vm0, %v6480_v1 }
 0xedf   :  { %5990 = vmatprep.subr.bf16.mxu0 %v6478_v0 }
 0xee2   :  { %5992 = vmatpush3.bf16.msra.mxu0 %v6817_v52 }
 0xee3   :  { %5999 = vmatprep.subr.bf16.mxu0 %v6478_v0 }
 0xee4   :  { %v2806_v36 = vpop.f32.mrb[32].mxu1 }
 0xee5   :  { %v5579_v15 = vpop.f32.mrb[33].mxu1  ;;  %5589 = vmatmul.mubr.msk.f32.vlgmr.msra.gmra.mrb[30].mxu0 %vm153_vm1, %v2505_v9  ;;  %v2811_v35 = vrot.slane %v2806_v36, 5 }
 0xee6   :  { %6001 = vmatpush3.bf16.msra.mxu0 %v6847_v61  ;;  %5610 = vmatprep.mubr.msk.f32.mxu0 %vm6479_vm0, %v6480_v1 }
 0xee7   :  { %6002 = vmatprep.subr.bf16.mxu0 %v6478_v0 }
 0xeea   :  { %6004 = vmatpush3.bf16.msra.mxu0 %v6851_v2 }
 0xeeb   :  { %6005 = vmatprep.subr.bf16.mxu0 %v6478_v0 }
 0xeec   :  { %v2960_v16 = vpop.f32.mrb[34].mxu1 }
 0xeed   :  { %v5601_v18 = vpop.f32.mrb[35].mxu1  ;;  %v2961_v50 = vadd.f32 %v2960_v16, %v6875_v32 }
 0xeef   :  { %v2965_v57 = vrot.slane %v2961_v50, 5 }
 0xfa8   :  { %v2578_v19 = vpop.f32.mrb[26].mxu0 }
 0xfa9   :  { %v2583_v21 = vrot.slane %v2578_v19, 5  ;;  %v5546_v22 = vpop.f32.mrb[27].mxu0 }
 0xfab   :  { %v2585_v24 = vadd.f32 %v2583_v21, %v6863_v11 }
 0xfad   :  { %v2659_v25 = vadd.f32 %v2657_v23, %v2585_v24 }
 0xfaf   :  { %v4946_v27 = vmul.f32 -1.442695, %v2659_v25 }
 0xfb0   :  { %v2732_v28 = vpop.f32.mrb[28].mxu0 }
 0xfb1   :  { %6165 = vpow2.f32 %v4946_v27  ;;  %v2737_v30 = vrot.slane %v2732_v28, 5  ;;  %v5568_v34 = vpop.f32.mrb[29].mxu0 }
 0xfb3   :  { %v2739_v40 = vadd.f32 %v2737_v30, %v6869_v17 }
 0xfb5   :  { %v2813_v10 = vadd.f32 %v2811_v35, %v2739_v40 }
 0xfb7   :  { %v4949_v42 = vmul.f32 -1.442695, %v2813_v10 }
 0xfb8   :  { %v2886_v54 = vpop.f32.mrb[30].mxu0 }
 0xfb9   :  { %6167 = vpow2.f32 %v4949_v42  ;;  %v5590_v12 = vpop.f32.mrb[31].mxu0  ;;  %v2891_v56 = vrot.slane %v2886_v54, 5 }
 0xfbb   :  { %v6166_v47 = vpop.eup %6165  ;;  %v2893_v59 = vadd.f32 %v2891_v56, %v6881_v37 }
 0xfbc   :  { %v2663_v48 = vadd.f32 1.0, %v6166_v47 }
 0xfbe   :  { %6169 = vrcp.f32 %v2663_v48 }
 0xfc3   :  { %v6168_v49 = vpop.eup %6167 }
 0xfc4   :  { %v2817_v53 = vadd.f32 1.0, %v6168_v49 }
 0xfc6   :  { %6171 = vrcp.f32 %v2817_v53 }
 0xfc8   :  { %v6170_v45 = vpop.eup %6169 }
 0xfc9   :  { %v2967_v60 = vmul.f32 %v6170_v45, %v2965_v57 }
 0xfcb   :  { %v2968_v62 = vadd.f32 %v2967_v60, %v2893_v59 }
 0xfcd   :  { %6173 = vtanh.f32 %v2968_v62 }
 0xfd0   :  { %v6172_v4 = vpop.eup %6171 }
 0xfd1   :  { %v2974_v5 = vmul.f32 %v6172_v4, %v2972_v63  ;;  %v2970_v9 = vsub.f32 1.0, %v6172_v4 }
 0xfd7   :  { %v6174_v29 = vpop.eup %6173 }
 0xfd8   :  { %v2971_v7 = vmul.f32 %v6174_v29, %v2970_v9 }
 0xfda   :  { %v7130_v13 = vadd.f32 %v2974_v5, %v2971_v7 }
 0xfdc   :  { %v2977_v14 = vrot.slane %v7130_v13, 3  ;;  %v7136_v36 = vsel %vm4607_vm6, %v7051_v43, %v7130_v13 }
 0xfde   :  { %5611 = vmatmul.mubr.msk.f32.vlgmr.msra.gmra.mrb[32].mxu0 %vm153_vm1, %v2977_v14 }
 0xfdf   :  { %6007 = vmatpush3.bf16.msra.mxu0 %v6728_v20  ;;  %5631 = vmatprep.mubr.msk.f32.mxu0 %vm6479_vm0, %v6480_v1 }
 0xfe0   :  { %6008 = vmatprep.subr.bf16.mxu0 %v6478_v0 }
 0xfe3   :  { %6010 = vmatpush3.bf16.msra.mxu0 %v6747_v26 }
 0xfe4   :  { %6017 = vmatprep.subr.bf16.mxu0 %v6478_v0 }
0x10b1   :  { %v3046_v41 = vpop.f32.mrb[32].mxu0 }
0x10b2   :  { %v5612_v15 = vpop.f32.mrb[33].mxu0  ;;  %5616 = vmatmul.mubr.msk.f32.vlgmr.msra.gmra.mrb[36].mxu1 %vm153_vm1, %v3046_v41 }
0x10b3   :  { %5619 = vmatpush3.msra.mxu1 %v6855_v3  ;;  %5620 = vmatprep.mubr.msk.f32.mxu1 %vm6479_vm0, %v6480_v1 }
0x10b4   :  { %6011 = vmatprep.subr.bf16.mxu1 %v6478_v0 }
0x1185   :  { %v3119_v43 = vpop.f32.mrb[36].mxu1 }
0x1186   :  { %v5617_v16 = vpop.f32.mrb[37].mxu1  ;;  %v3123_v18 = vsel %vm1027_vm2, %v3119_v43, -inf }
0x1187   :  { %3124 = vmax.xlane.f32.xlu0 %v3123_v18 }
0x1214   :  { %v3125_v19 = vpop.xlane.xlu0 %3124 }
0x1215   :  { %v3126_v21 = vsub.f32 %v3119_v43, %v3125_v19 }
0x1217   :  { %v3127_v22 = vmul.f32 1.442695, %v3126_v21 }
0x1219   :  { %6175 = vpow2.f32 %v3127_v22 }
0x1223   :  { %v6176_v23 = vpop.eup %6175 }
0x1224   :  { %v3129_v24 = vsel %vm1027_vm2, %v6176_v23, 0.0 }
0x1225   :  { %3130 = vadd.xlane.f32.xlu1 %v3129_v24 }
0x12b2   :  { %v3131_v25 = vpop.xlane.xlu1 %3130 }
0x12b3   :  { %6177 = vrcp.f32 %v3131_v25  ;;  %v3670_v25 = vrot.slane %v7130_v13, 7 }
0x12bd   :  { %v6178_v27 = vpop.eup %6177 }
0x12be   :  { %v3133_v28 = vmul.f32 %v6178_v27, %v6176_v23 }
0x12c0   :  { %5621 = vmatmul.mubr.msk.f32.vlgmr.msra.gmra.mrb[38].mxu1 %vm1039_vm3, %v3133_v28  ;;  %v4633_v30 = vrot.slane %v3133_v28, 5 }
0x12c1   :  { %6013 = vmatpush3.bf16.msra.mxu1 %v6764_v33  ;;  %5642 = vmatprep.mubr.msk.f32.mxu1 %vm6479_vm0, %v6480_v1 }
0x12c2   :  { %6014 = vmatprep.subr.bf16.mxu1 %v6478_v0  ;;  %v7159_v34 = vsel %vm4607_vm6, %v7076_v6, %v4633_v30 }
0x12c5   :  { %6016 = vmatpush3.bf16.msra.mxu1 %v6780_v39 }
0x12c6   :  { %6023 = vmatprep.subr.bf16.mxu1 %v6478_v0 }
0x12c8   :  { %5643 = vmatmul.mubr.msk.f32.vlgmr.msra.gmra.mrb[40].mxu1 %vm153_vm1, %v2977_v14 }
0x12c9   :  { %6025 = vmatpush3.bf16.msra.mxu1 %v6794_v44  ;;  %5664 = vmatprep.mubr.msk.f32.mxu1 %vm6479_vm0, %v6480_v1 }
0x12ca   :  { %6026 = vmatprep.subr.bf16.mxu1 %v6478_v0 }
0x12cd   :  { %6028 = vmatpush3.bf16.msra.mxu1 %v6813_v51 }
0x12ce   :  { %6035 = vmatprep.subr.bf16.mxu1 %v6478_v0 }
0x12d0   :  { %5665 = vmatmul.mubr.msk.f32.vlgmr.msra.gmra.mrb[42].mxu1 %vm153_vm1, %v2977_v14 }
0x12d1   :  { %6037 = vmatpush3.bf16.msra.mxu1 %v6825_v55  ;;  %5686 = vmatprep.mubr.msk.f32.mxu1 %vm6479_vm0, %v6480_v1 }
0x12d2   :  { %6038 = vmatprep.subr.bf16.mxu1 %v6478_v0 }
0x12d5   :  { %6040 = vmatpush3.bf16.msra.mxu1 %v6834_v58 }
0x12d6   :  { %5700 = vmatprep.subr.mxu1 %v6480_v1 }
0x12d8   :  { %5687 = vmatmul.mubr.msk.f32.vlgmr.msra.gmra.mrb[44].mxu1 %vm153_vm1, %v2977_v14 }
0x12d9   :  { %5702 = vmatprep.mubr.msk.f32.mxu1 %vm6479_vm0, %v6480_v1 }
0x12de   :  { %5701 = vmatpush3.xpose.msk.msra.mxu1 %vm153_vm1, %v6855_v3 }
0x12df   :  { %5705 = vmatprep.subr.mxu1 %v6480_v1 }
0x1393   :  { %v3203_v6 = vpop.f32.mrb[38].mxu1 }
0x1394   :  { %v4617_v35 = vrot.slane %v3203_v6, 5  ;;  %v5622_v40 = vpop.f32.mrb[39].mxu1  ;;  %5632 = vmatmul.mubr.msk.f32.vlgmr.msra.gmra.mrb[34].mxu0 %vm153_vm1, %v3203_v6 }
0x1395   :  { %6019 = vmatpush3.bf16.msra.mxu0 %v6760_v31  ;;  %5653 = vmatprep.mubr.msk.f32.mxu0 %vm6479_vm0, %v6480_v1 }
0x1396   :  { %6020 = vmatprep.subr.bf16.mxu0 %v6478_v0  ;;  %v7190_v10 = vsel %vm4607_vm6, %v7106_v8, %v4617_v35 }
0x1399   :  { %6022 = vmatpush3.bf16.msra.mxu0 %v6776_v38 }
0x139a   :  { %6029 = vmatprep.subr.bf16.mxu0 %v6478_v0 }
0x139b   :  { %v3350_v3 = vpop.f32.mrb[40].mxu1 }
0x139c   :  { %v5644_v42 = vpop.f32.mrb[41].mxu1  ;;  %5654 = vmatmul.mubr.msk.f32.vlgmr.msra.gmra.mrb[36].mxu0 %vm153_vm1, %v3203_v6  ;;  %v3355_v53 = vrot.slane %v3350_v3, 4 }
0x139d   :  { %6031 = vmatpush3.bf16.msra.mxu0 %v6800_v46  ;;  %5675 = vmatprep.mubr.msk.f32.mxu0 %vm6479_vm0, %v6480_v1 }
0x139e   :  { %6032 = vmatprep.subr.bf16.mxu0 %v6478_v0 }
0x13a1   :  { %6034 = vmatpush3.bf16.msra.mxu0 %v6817_v52 }
0x13a2   :  { %6041 = vmatprep.subr.bf16.mxu0 %v6478_v0 }
0x13a3   :  { %v3504_v8 = vpop.f32.mrb[42].mxu1 }
0x13a4   :  { %v5666_v54 = vpop.f32.mrb[43].mxu1  ;;  %5676 = vmatmul.mubr.msk.f32.vlgmr.msra.gmra.mrb[38].mxu0 %vm153_vm1, %v3203_v6  ;;  %v3509_v63 = vrot.slane %v3504_v8, 4  ;;  %v7229_v8 = vld [vmem:[#allocation7] sm:$0xff] }
0x13a5   :  { %6043 = vmatpush3.bf16.msra.mxu0 %v6847_v61  ;;  %5697 = vmatprep.mubr.msk.f32.mxu0 %vm6479_vm0, %v6480_v1 }
0x13a6   :  { %6044 = vmatprep.subr.bf16.mxu0 %v6478_v0 }
0x13a9   :  { %6046 = vmatpush3.bf16.msra.mxu0 %v6851_v2 }
0x13aa   :  { %6047 = vmatprep.subr.bf16.mxu0 %v6478_v0 }
0x13ab   :  { %v3658_v12 = vpop.f32.mrb[44].mxu1 }
0x13ac   :  { %v5688_v47 = vpop.f32.mrb[45].mxu1  ;;  %v3659_v43 = vadd.f32 %v3658_v12, %v6875_v32 }
0x13ae   :  { %v3663_v19 = vrot.slane %v3659_v43, 4 }
0x1467   :  { %v3276_v48 = vpop.f32.mrb[34].mxu0 }
0x1468   :  { %v3281_v49 = vrot.slane %v3276_v48, 4  ;;  %v5633_v50 = vpop.f32.mrb[35].mxu0 }
0x146a   :  { %v3283_v56 = vadd.f32 %v3281_v49, %v6863_v11 }
0x146c   :  { %v3357_v57 = vadd.f32 %v3355_v53, %v3283_v56 }
0x146e   :  { %v4958_v45 = vmul.f32 -1.442695, %v3357_v57 }
0x146f   :  { %v3430_v59 = vpop.f32.mrb[36].mxu0 }
0x1470   :  { %6179 = vpow2.f32 %v4958_v45  ;;  %v3435_v60 = vrot.slane %v3430_v59, 4  ;;  %v5655_v62 = vpop.f32.mrb[37].mxu0 }
0x1472   :  { %v3437_v4 = vadd.f32 %v3435_v60, %v6869_v17 }
0x1474   :  { %v3511_v5 = vadd.f32 %v3509_v63, %v3437_v4 }
0x1476   :  { %v4961_v9 = vmul.f32 -1.442695, %v3511_v5 }
0x1477   :  { %v3584_v29 = vpop.f32.mrb[38].mxu0 }
0x1478   :  { %6181 = vpow2.f32 %v4961_v9  ;;  %v5677_v7 = vpop.f32.mrb[39].mxu0  ;;  %v3589_v18 = vrot.slane %v3584_v29, 4 }
0x147a   :  { %v6180_v14 = vpop.eup %6179  ;;  %v3591_v22 = vadd.f32 %v3589_v18, %v6881_v37 }
0x147b   :  { %v3361_v41 = vadd.f32 1.0, %v6180_v14 }
0x147d   :  { %6183 = vrcp.f32 %v3361_v41 }
0x1482   :  { %v6182_v15 = vpop.eup %6181 }
0x1483   :  { %v3515_v16 = vadd.f32 1.0, %v6182_v15 }
0x1485   :  { %6185 = vrcp.f32 %v3515_v16 }
0x1487   :  { %v6184_v21 = vpop.eup %6183 }
0x1488   :  { %v3665_v23 = vmul.f32 %v6184_v21, %v3663_v19 }
0x148a   :  { %v3666_v24 = vadd.f32 %v3665_v23, %v3591_v22 }
0x148c   :  { %6187 = vtanh.f32 %v3666_v24 }
0x148f   :  { %v6186_v27 = vpop.eup %6185 }
0x1490   :  { %v3672_v28 = vmul.f32 %v6186_v27, %v3670_v25  ;;  %v3668_v30 = vsub.f32 1.0, %v6186_v27 }
0x1496   :  { %v6188_v6 = vpop.eup %6187 }
0x1497   :  { %v3669_v35 = vmul.f32 %v6188_v6, %v3668_v30 }
0x1499   :  { %v7213_v40 = vadd.f32 %v3672_v28, %v3669_v35 }
0x149b   :  { %v3675_v32 = vrot.slane %v7213_v40, 4  ;;  %v7219_v3 = vsel %vm4609_vm7, %v7136_v36, %v7213_v40  ;;  %v4368_v28 = vrot.slane %v7213_v40, 7 }
0x149d   :  { %5698 = vmatmul.mubr.msk.f32.vlgmr.msra.gmra.mrb[40].mxu0 %vm153_vm1, %v3675_v32 }
0x149e   :  { %6049 = vmatpush3.bf16.msra.mxu0 %v6728_v20  ;;  %5718 = vmatprep.mubr.msk.f32.mxu0 %vm6479_vm0, %v6480_v1 }
0x149f   :  { %6050 = vmatprep.subr.bf16.mxu0 %v6478_v0 }
0x14a2   :  { %6052 = vmatpush3.bf16.msra.mxu0 %v6747_v26 }
0x14a3   :  { %6059 = vmatprep.subr.bf16.mxu0 %v6478_v0 }
0x1570   :  { %v3744_v13 = vpop.f32.mrb[40].mxu0 }
0x1571   :  { %v5699_v42 = vpop.f32.mrb[41].mxu0  ;;  %5703 = vmatmul.mubr.msk.f32.vlgmr.msra.gmra.mrb[46].mxu1 %vm153_vm1, %v3744_v13 }
0x1572   :  { %5706 = vmatpush3.msra.mxu1 %v7229_v8  ;;  %5707 = vmatprep.mubr.msk.f32.mxu1 %vm6479_vm0, %v6480_v1 }
0x1573   :  { %6053 = vmatprep.subr.bf16.mxu1 %v6478_v0 }
0x1644   :  { %v3817_v20 = vpop.f32.mrb[46].mxu1 }
0x1645   :  { %v5704_v36 = vpop.f32.mrb[47].mxu1  ;;  %v3821_v54 = vsel %vm1027_vm2, %v3817_v20, -inf }
0x1646   :  { %3822 = vmax.xlane.f32.xlu0 %v3821_v54 }
0x16d3   :  { %v3823_v26 = vpop.xlane.xlu0 %3822 }
0x16d4   :  { %v3824_v12 = vsub.f32 %v3817_v20, %v3823_v26 }
0x16d6   :  { %v3825_v47 = vmul.f32 1.442695, %v3824_v12 }
0x16d8   :  { %6189 = vpow2.f32 %v3825_v47 }
0x16e2   :  { %v6190_v48 = vpop.eup %6189 }
0x16e3   :  { %v3827_v49 = vsel %vm1027_vm2, %v6190_v48, 0.0 }
0x16e4   :  { %3828 = vadd.xlane.f32.xlu1 %v3827_v49 }
0x1771   :  { %v3829_v50 = vpop.xlane.xlu1 %3828 }
0x1772   :  { %6191 = vrcp.f32 %v3829_v50 }
0x177c   :  { %v6192_v53 = vpop.eup %6191 }
0x177d   :  { %v3831_v56 = vmul.f32 %v6192_v53, %v6190_v48  ;;  %v4648_v53 = vld [vmem:[#allocation13] sm:$0xff] }
0x177f   :  { %5708 = vmatmul.mubr.msk.f32.vlgmr.msra.gmra.mrb[48].mxu1 %vm1039_vm3, %v3831_v56  ;;  %v4635_v57 = vrot.slane %v3831_v56, 4 }
0x1780   :  { %6055 = vmatpush3.bf16.msra.mxu1 %v6764_v33  ;;  %5729 = vmatprep.mubr.msk.f32.mxu1 %vm6479_vm0, %v6480_v1 }
0x1781   :  { %6056 = vmatprep.subr.bf16.mxu1 %v6478_v0  ;;  %v7244_v45 = vsel %vm4609_vm7, %v7159_v34, %v4635_v57 }
0x1784   :  { %6058 = vmatpush3.bf16.msra.mxu1 %v6780_v39 }
0x1785   :  { %6065 = vmatprep.subr.bf16.mxu1 %v6478_v0 }
0x1787   :  { %5730 = vmatmul.mubr.msk.f32.vlgmr.msra.gmra.mrb[50].mxu1 %vm153_vm1, %v3675_v32 }
0x1788   :  { %6067 = vmatpush3.bf16.msra.mxu1 %v6794_v44  ;;  %5751 = vmatprep.mubr.msk.f32.mxu1 %vm6479_vm0, %v6480_v1 }
0x1789   :  { %6068 = vmatprep.subr.bf16.mxu1 %v6478_v0 }
0x178c   :  { %6070 = vmatpush3.bf16.msra.mxu1 %v6813_v51 }
0x178d   :  { %6077 = vmatprep.subr.bf16.mxu1 %v6478_v0 }
0x178f   :  { %5752 = vmatmul.mubr.msk.f32.vlgmr.msra.gmra.mrb[52].mxu1 %vm153_vm1, %v3675_v32 }
0x1790   :  { %6079 = vmatpush3.bf16.msra.mxu1 %v6825_v55  ;;  %5773 = vmatprep.mubr.msk.f32.mxu1 %vm6479_vm0, %v6480_v1 }
0x1791   :  { %6080 = vmatprep.subr.bf16.mxu1 %v6478_v0 }
0x1794   :  { %6082 = vmatpush3.bf16.msra.mxu1 %v6834_v58 }
0x1795   :  { %5787 = vmatprep.subr.mxu1 %v6480_v1 }
0x1797   :  { %5774 = vmatmul.mubr.msk.f32.vlgmr.msra.gmra.mrb[54].mxu1 %vm153_vm1, %v3675_v32 }
0x1798   :  { %5789 = vmatprep.mubr.msk.f32.mxu1 %vm6479_vm0, %v6480_v1 }
0x179d   :  { %5788 = vmatpush3.xpose.msk.msra.mxu1 %vm153_vm1, %v7229_v8 }
0x179e   :  { %5792 = vmatprep.subr.mxu1 %v6480_v1 }
0x1852   :  { %v3901_v33 = vpop.f32.mrb[48].mxu1 }
0x1853   :  { %v4619_v39 = vrot.slane %v3901_v33, 4  ;;  %v5709_v44 = vpop.f32.mrb[49].mxu1  ;;  %5719 = vmatmul.mubr.msk.f32.vlgmr.msra.gmra.mrb[42].mxu0 %vm153_vm1, %v3901_v33 }
0x1854   :  { %6061 = vmatpush3.bf16.msra.mxu0 %v6760_v31  ;;  %5740 = vmatprep.mubr.msk.f32.mxu0 %vm6479_vm0, %v6480_v1 }
0x1855   :  { %6062 = vmatprep.subr.bf16.mxu0 %v6478_v0  ;;  %v7275_v51 = vsel %vm4609_vm7, %v7190_v10, %v4619_v39  ;;  %v4645_v39 = vld [vmem:[#allocation11 + $0x8] sm:$0xff] }
0x1858   :  { %6064 = vmatpush3.bf16.msra.mxu0 %v6776_v38 }
0x1859   :  { %6071 = vmatprep.subr.bf16.mxu0 %v6478_v0 }
0x185a   :  { %v4048_v55 = vpop.f32.mrb[50].mxu1 }
0x185b   :  { %v5731_v58 = vpop.f32.mrb[51].mxu1  ;;  %5741 = vmatmul.mubr.msk.f32.vlgmr.msra.gmra.mrb[44].mxu0 %vm153_vm1, %v3901_v33  ;;  %v4053_v60 = vrot.slane %v4048_v55, 3 }
0x185c   :  { %6073 = vmatpush3.bf16.msra.mxu0 %v6800_v46  ;;  %5762 = vmatprep.mubr.msk.f32.mxu0 %vm6479_vm0, %v6480_v1 }
0x185d   :  { %6074 = vmatprep.subr.bf16.mxu0 %v6478_v0 }
0x1860   :  { %6076 = vmatpush3.bf16.msra.mxu0 %v6817_v52 }
0x1861   :  { %6083 = vmatprep.subr.bf16.mxu0 %v6478_v0 }
0x1862   :  { %v4202_v31 = vpop.f32.mrb[52].mxu1 }
0x1863   :  { %v5753_v34 = vpop.f32.mrb[53].mxu1  ;;  %5763 = vmatmul.mubr.msk.f32.vlgmr.msra.gmra.mrb[46].mxu0 %vm153_vm1, %v3901_v33  ;;  %v4207_v29 = vrot.slane %v4202_v31, 3  ;;  %v4644_v33 = vld [vmem:[#allocation11] sm:$0xff]  ;;  %v4646_v31 = vld [vmem:[#allocation11 + $0x10] sm:$0xff] }
0x1864   :  { %6085 = vmatpush3.bf16.msra.mxu0 %v6847_v61  ;;  %5784 = vmatprep.mubr.msk.f32.mxu0 %vm6479_vm0, %v6480_v1  ;;  %v6096_v55 = vpack.c.bf16 %v4645_v39, %v4644_v33  ;;  %v4647_v34 = vld [vmem:[#allocation11 + $0x18] sm:$0xff] }
0x1865   :  { %6086 = vmatprep.subr.bf16.mxu0 %v6478_v0 }
0x1868   :  { %6088 = vmatpush3.bf16.msra.mxu0 %v6851_v2 }
0x1869   :  { %6089 = vmatprep.subr.bf16.mxu0 %v6478_v0 }
0x186a   :  { %v4356_v38 = vpop.f32.mrb[54].mxu1 }
0x186b   :  { %v5775_v46 = vpop.f32.mrb[55].mxu1 }
0x186c   :  { %v6099_v46 = vpack.c.bf16 %v4647_v34, %v4646_v31 }
0x1926   :  { %v3974_v52 = vpop.f32.mrb[42].mxu0 }
0x1927   :  { %v3979_v10 = vrot.slane %v3974_v52, 3  ;;  %v5720_v59 = vpop.f32.mrb[43].mxu0 }
0x1928   :  { %v4651_v59 = vld [vmem:[#allocation13 + $0x18] sm:$0xff] }
0x1929   :  { %v3981_v62 = vadd.f32 %v3979_v10, %v6863_v11  ;;  %v6212_v11 = vld [vmem:[%s7391_s8] sm:$0x1] }
0x192a   :  { %v4357_v19 = vadd.f32 %v6212_v11, %v4356_v38  ;;  %v4650_v10 = vld [vmem:[#allocation13 + $0x10] sm:$0xff] }
0x192b   :  { %v4055_v63 = vadd.f32 %v4053_v60, %v3981_v62  ;;  %v6093_v60 = vpack.c.bf16 %v4651_v59, %v4650_v10 }
0x192c   :  { %v4361_v23 = vrot.slane %v4357_v19, 3 }
0x192d   :  { %v4970_v4 = vmul.f32 -1.442695, %v4055_v63 }
0x192e   :  { %v4128_v61 = vpop.f32.mrb[44].mxu0 }
0x192f   :  { %6193 = vpow2.f32 %v4970_v4  ;;  %v4133_v5 = vrot.slane %v4128_v61, 3  ;;  %v5742_v9 = vpop.f32.mrb[45].mxu0 }
0x1931   :  { %v4135_v7 = vadd.f32 %v4133_v5, %v6869_v17  ;;  %v4982_v5 = vld [vmem:[%s7395_s12] ss:$0 sm:$0xff]  ;;  %s6367_s12 = scalar_lea.vmem %s4842_s21, 128 }
0x1932   :  { %p6368_p0 = scmp.ne.s32.totalorder %s4842_s21, %s6367_s12  ;;  %p6373_p2 = scmp.lt.s32.totalorder %s6367_s12, %s6367_s12 }
0x1933   :  { %v4209_v2 = vadd.f32 %v4207_v29, %v4135_v7 }
0x1934   :  { %p6374_p3 = por %p6373_p2, %p6372_p1 }
0x1935   :  { %v4973_v14 = vmul.f32 -1.442695, %v4209_v2 }
0x1936   :  { %v4282_v41 = vpop.f32.mrb[46].mxu0  ;;  %p6375_p4 = pnand %p6374_p3, %p6368_p0 }
0x1937   :  { %6195 = vpow2.f32 %v4973_v14  ;;  %v5764_v15 = vpop.f32.mrb[47].mxu0  ;;  %v4287_v22 = vrot.slane %v4282_v41, 3 }
0x1939   :  { %v6194_v43 = vpop.eup %6193  ;;  %v4289_v17 = vadd.f32 %v4287_v22, %v6881_v37 }
0x193a   :  { %v4059_v16 = vadd.f32 1.0, %v6194_v43 }
0x193c   :  { %6197 = vrcp.f32 %v4059_v16 }
0x1941   :  { %v6196_v18 = vpop.eup %6195 }
0x1942   :  { %v4213_v21 = vadd.f32 1.0, %v6196_v18 }
0x1944   :  { %6199 = vrcp.f32 %v4213_v21 }
0x1946   :  { %v6198_v24 = vpop.eup %6197 }
0x1947   :  { %v4363_v25 = vmul.f32 %v6198_v24, %v4361_v23 }
0x1949   :  { %v4364_v27 = vadd.f32 %v4363_v25, %v4289_v17 }
0x194b   :  { %6201 = vtanh.f32 %v4364_v27 }
0x194e   :  { %v6200_v30 = vpop.eup %6199 }
0x194f   :  { %v4370_v6 = vmul.f32 %v6200_v30, %v4368_v28  ;;  %v4366_v35 = vsub.f32 1.0, %v6200_v30 }
0x1955   :  { %v6202_v32 = vpop.eup %6201 }
0x1956   :  { %v4367_v13 = vmul.f32 %v6202_v32, %v4366_v35 }
0x1958   :  { %v4371_v42 = vadd.f32 %v4370_v6, %v4367_v13 }
0x195a   :  { %v4373_v20 = vrot.slane %v4371_v42, 5  ;;  %v4612_v36 = vsel %vm4611_vm8, %v7219_v3, %v4371_v42 }
0x195b   :  { %4822 = vst.msk [vmem:[#allocation17] sm:$0x3f] %vm4820_vm9, %v4612_v36 }
0x195c   :  { %5785 = vmatmul.mubr.msk.f32.vlgmr.msra.gmra.mrb[48].mxu0 %vm153_vm1, %v4373_v20 }
0x195d   :  { %5805 = vmatprep.mubr.msk.f32.mxu0 %vm6479_vm0, %v6480_v1 }
0x1a2f   :  { %v4442_v37 = vpop.f32.mrb[48].mxu0 }
0x1a30   :  { %v5786_v40 = vpop.f32.mrb[49].mxu0  ;;  %5790 = vmatmul.mubr.msk.f32.vlgmr.msra.gmra.mrb[56].mxu1 %vm153_vm1, %v4442_v37 }
0x1a31   :  { %5793 = vmatpush3.msra.mxu1 %v7229_v8  ;;  %5794 = vmatprep.mubr.msk.f32.mxu1 %vm6479_vm0, %v6480_v1  ;;  %v4649_v8 = vld [vmem:[#allocation13 + $0x8] sm:$0xff] }
0x1a32   :  { %6095 = vmatprep.subr.bf16.mxu1 %v6478_v0  ;;  %v6090_v56 = vpack.c.bf16 %v4649_v8, %v4648_v53 }
0x1a34   :  { %6091 = vmatpush3.bf16.msra.mxu0 %v6090_v56 }
0x1a35   :  { %6092 = vmatprep.subr.bf16.mxu0 %v6478_v0 }
0x1a38   :  { %6094 = vmatpush3.bf16.msra.mxu0 %v6093_v60 }
0x1b03   :  { %v4515_v54 = vpop.f32.mrb[56].mxu1 }
0x1b04   :  { %v5791_v3 = vpop.f32.mrb[57].mxu1  ;;  %v4519_v26 = vsel %vm1027_vm2, %v4515_v54, -inf }
0x1b05   :  { %4520 = vmax.xlane.f32.xlu0 %v4519_v26 }
0x1b92   :  { %v4521_v12 = vpop.xlane.xlu0 %4520 }
0x1b93   :  { %v4522_v47 = vsub.f32 %v4515_v54, %v4521_v12 }
0x1b95   :  { %v4523_v48 = vmul.f32 1.442695, %v4522_v47 }
0x1b97   :  { %6203 = vpow2.f32 %v4523_v48 }
0x1ba1   :  { %v6204_v49 = vpop.eup %6203 }
0x1ba2   :  { %v4525_v50 = vsel %vm1027_vm2, %v6204_v49, 0.0 }
0x1ba3   :  { %4526 = vadd.xlane.f32.xlu1 %v4525_v50 }
0x1c30   :  { %v4527_v57 = vpop.xlane.xlu1 %4526 }
0x1c31   :  { %6205 = vrcp.f32 %v4527_v57 }
0x1c3b   :  { %v6206_v44 = vpop.eup %6205 }
0x1c3c   :  { %v4529_v58 = vmul.f32 %v6206_v44, %v6204_v49 }
0x1c3e   :  { %5795 = vmatmul.mubr.msk.f32.vlgmr.msra.gmra.mrb[58].mxu1 %vm1039_vm3, %v4529_v58  ;;  %v4637_v38 = vrot.slane %v4529_v58, 3 }
0x1c3f   :  { %6097 = vmatpush3.bf16.msra.mxu1 %v6096_v55  ;;  %5816 = vmatprep.mubr.msk.f32.mxu1 %vm6479_vm0, %v6480_v1 }
0x1c40   :  { %6098 = vmatprep.subr.bf16.mxu1 %v6478_v0  ;;  %v4643_v52 = vsel %vm4611_vm8, %v7244_v45, %v4637_v38 }
0x1c41   :  { %4824 = vst.msk [vmem:[#allocation18] sm:$0x3f] %vm4823_vm10, %v4643_v52 }
0x1c43   :  { %6100 = vmatpush3.bf16.msra.mxu1 %v6099_v46 }
0x1c46   :  { %5817 = vmatmul.mubr.msk.f32.vlgmr.msra.gmra.mrb[60].mxu1 %vm153_vm1, %v4612_v36 }
0x1d11   :  { %v4599_v62 = vpop.f32.mrb[58].mxu1 }
0x1d12   :  { %v4622_v63 = vrot.slane %v4599_v62, 3  ;;  %v5796_v4 = vpop.f32.mrb[59].mxu1 }
0x1d14   :  { %v4628_v61 = vsel %vm4611_vm8, %v7275_v51, %v4622_v63 }
0x1d15   :  { %5806 = vmatmul.mubr.msk.f32.vlgmr.msra.gmra.mrb[50].mxu0 %vm153_vm1, %v4628_v61  ;;  %4821 = vst.msk [vmem:[#allocation15] sm:$0x3f] %vm4820_vm9, %v4628_v61 }
0x1d19   :  { %v4794_v0 = vpop.f32.mrb[60].mxu1 }
0x1d1a   :  { %v5818_v1 = vpop.f32.mrb[61].mxu1 }
0x1de8   :  { %v4721_v45 = vpop.f32.mrb[50].mxu0 }
0x1de9   :  { %v4795_v9 = vadd.f32 %v4794_v0, %v4721_v45  ;;  %v5807_v29 = vpop.f32.mrb[51].mxu0 }
0x1deb   :  { %v4805_v7 = vadd.f32 %v4982_v5, %v4795_v9 }
0x1ded   :  { %v4807_v2 = vsel %vm4806_vm11, %v4805_v7, -inf }
0x1dee   :  { %4808 = vmax.xlane.f32.xlu0 %v4807_v2 }
0x1e7b   :  { %v4809_v14 = vpop.xlane.xlu0 %4808 }
0x1e7c   :  { %v7329_v51 = vsub.f32 %v4805_v7, %v4809_v14 }
0x1e7e   :  { %v4811_v41 = vmul.f32 1.442695, %v7329_v51 }
0x1e80   :  { %6207 = vpow2.f32 %v4811_v41 }
0x1e8a   :  { %v6208_v15 = vpop.eup %6207 }
0x1e8b   :  { %v4813_v43 = vsel %vm4806_vm11, %v6208_v15, 0.0 }
0x1e8c   :  { %4814 = vadd.xlane.f32.xlu1 %v4813_v43 }
0x1e8d   :  { %6378 = shalt.err (!%p6375_p4)
}
0x1e8e   :  { %s6379_s10 = scalar_lea.hbm %s7397_s14, 128 }
0x1e8f   :  { %p6380_p5 = scmp.ne.s32.totalorder %s7397_s14, %s6379_s10  ;;  %p6383_p6 = scmp.lt.u32.totalorder %s6379_s10, %s7397_s14 }
0x1e91   :  { %p6385_p7 = pnand %p6383_p6, %p6380_p5 }
0x1e93   :  { %6388 = shalt.err (!%p6385_p7)
}
0x1e94   :  { %4844 = dma.vmem_to_hbm [thread:$0]  %s4842_s21, 128, %s7397_s14, [#allocation16]  }
0x1e95   :  { %s6482_s30 = smov [#allocation17]   ;;  %s6483_s17 = smov [#allocation18]  }
0x1e96   :  { %s4851_s24 = sshll.u32 %s6482_s30, 4  ;;  %s4861_s5 = sshll.u32 %s6483_s17, 4  ;;  %s4852_s24 = int_to_ptr.vmem [resolvable:$true] %s4851_s24  ;;  %s4862_s5 = int_to_ptr.vmem [resolvable:$true] %s4861_s5 }
0x1e97   :  { %s6389_s18 = scalar_lea.vmem %s4852_s24, 128  ;;  %p6394_p9 = scmp.lt.s32.totalorder %s4852_s24, %s4852_s24 }
0x1e98   :  { %p6390_p8 = scmp.ne.s32.totalorder %s4852_s24, %s6389_s18  ;;  %p6395_p10 = scmp.lt.s32.totalorder %s6389_s18, %s6389_s18 }
0x1e9a   :  { %p6396_p11 = por %p6395_p10, %p6394_p9 }
0x1e9c   :  { %p6397_p12 = pnand %p6396_p11, %p6390_p8 }
0x1e9e   :  { %6400 = shalt.err (!%p6397_p12)
}
0x1e9f   :  { %s6401_s6 = scalar_lea.hbm %s7398_s15, 128 }
0x1ea0   :  { %p6402_p13 = scmp.ne.s32.totalorder %s7398_s15, %s6401_s6  ;;  %p6405_p0 = scmp.lt.u32.totalorder %s6401_s6, %s7398_s15 }
0x1ea2   :  { %p6407_p1 = pnand %p6405_p0, %p6402_p13 }
0x1ea4   :  { %6410 = shalt.err (!%p6407_p1)
}
0x1ea5   :  { %4854 = dma.vmem_to_hbm [thread:$0]  %s4852_s24, 128, %s7398_s15, [#allocation16]  }
0x1ea6   :  { %s6411_s8 = scalar_lea.vmem %s4862_s5, 128  ;;  %p6416_p3 = scmp.lt.s32.totalorder %s4862_s5, %s4862_s5 }
0x1ea7   :  { %p6412_p2 = scmp.ne.s32.totalorder %s4862_s5, %s6411_s8  ;;  %p6417_p4 = scmp.lt.s32.totalorder %s6411_s8, %s6411_s8 }
0x1ea9   :  { %p6418_p5 = por %p6417_p4, %p6416_p3 }
0x1eab   :  { %p6419_p6 = pnand %p6418_p5, %p6412_p2 }
0x1ead   :  { %6422 = shalt.err (!%p6419_p6)
}
0x1eae   :  { %s6423_s21 = scalar_lea.hbm %s7399_s16, 128 }
0x1eaf   :  { %p6424_p7 = scmp.ne.s32.totalorder %s7399_s16, %s6423_s21  ;;  %p6427_p8 = scmp.lt.u32.totalorder %s6423_s21, %s7399_s16 }
0x1eb1   :  { %p6429_p9 = pnand %p6427_p8, %p6424_p7 }
0x1eb3   :  { %6432 = shalt.err (!%p6429_p9)
}
0x1eb4   :  { %4864 = dma.vmem_to_hbm [thread:$0]  %s4862_s5, 128, %s7399_s16, [#allocation19]  }
0x1eb5   :  { %s6484_s9 = smov [#allocation14]  }
0x1eb6   :  { %s4831_s0 = sshll.u32 %s6484_s9, 4  ;;  %s4832_s0 = int_to_ptr.vmem [resolvable:$true] %s4831_s0 }
0x1eb7   :  { %s6433_s11 = scalar_lea.vmem %s4832_s0, 128  ;;  %p6438_p11 = scmp.lt.s32.totalorder %s4832_s0, %s4832_s0 }
0x1eb8   :  { %p6434_p10 = scmp.ne.s32.totalorder %s4832_s0, %s6433_s11  ;;  %p6439_p12 = scmp.lt.s32.totalorder %s6433_s11, %s6433_s11 }
0x1eba   :  { %p6440_p13 = por %p6439_p12, %p6438_p11 }
0x1ebc   :  { %p6441_p0 = pnand %p6440_p13, %p6434_p10 }
0x1f19   :  { %v4815_v16 = vpop.xlane.xlu1 %4814 }
0x1f1a   :  { %6209 = vlog2.f32 %v4815_v16 }
0x1f24   :  { %v6210_v18 = vpop.eup %6209 }
0x1f25   :  { %v4817_v11 = vmul.f32 0.6931472, %v6210_v18 }
0x1f27   :  { %v4818_v19 = vsub.f32 %v7329_v51, %v4817_v11 }
0x1f29   :  { %4819 = vst.msk [vmem:[#allocation14] sm:$0x3f] %vm4806_vm11, %v4818_v19 }
0x1f2a   :  { %6444 = shalt.err (!%p6441_p0)
}
0x1f2b   :  { %s6445_s22 = scalar_lea.hbm %s7396_s13, 128 }
0x1f2c   :  { %p6446_p1 = scmp.ne.s32.totalorder %s7396_s13, %s6445_s22  ;;  %p6449_p2 = scmp.lt.u32.totalorder %s6445_s22, %s7396_s13 }
0x1f2e   :  { %p6451_p3 = pnand %p6449_p2, %p6446_p1 }
0x1f30   :  { %6454 = shalt.err (!%p6451_p3)
}
0x1f31   :  { %4834 = dma.vmem_to_hbm [thread:$0]  %s4832_s0, 128, %s7396_s13, [#allocation4]  }
0x1f32   :  { %6463 = dma.done.wait [#allocation4], 128  }
0x1f33   :  { %6464 = vsyncadd [#allocation4], 4294967168 }
0x1f34   :  { %6465 = dma.done.wait [#allocation16], 256  }
0x1f35   :  { %6466 = vsyncadd [#allocation16], 4294967040 }
0x1f36   :  { %6467 = dma.done.wait [#allocation19], 128  }
0x1f37   :  { %6468 = vsyncadd [#allocation19], 4294967168 }
0x1f38   :  { %4877 = vsyncpa [#allocation3], 1 }
0x1f39   :  { %4878 = vsyncpa [#allocation6], 1 }
0x1f3a   :  { %4879 = vsyncpa [#allocation9], 1 }
0x1f3b   :  { %4880 = vsyncpa [#allocation12], 1 }
0x1f3c   :  { %4881 = vsyncpa [#allocation4], 1 }
0x1f3d   :  { %4882 = vsyncpa [#allocation16], 1 }
0x1f3e   :  { %4883 = vsyncpa [#allocation19], 1 }

</bundles_post_ra>
